<compile_context>
chip_gen: v7x
topology: tpu7x:2x2x1
jax: 0.10.0
libtpu: 0.0.40
codegen_flags: <defaults>
</compile_context>

<pallas_src>
import functools

import numpy as np

import jax
import jax.numpy as jnp
from jax.experimental import pallas as pl
from jax.experimental.pallas import tpu as pltpu


# --------------------------------------------------------------------------- #
# Pallas kernel
# --------------------------------------------------------------------------- #
def _lane_roll(v, off, n):
    """result[:, p] = v[:, (p + off) % n] for a static integer offset (lane axis)."""
    s = off % n
    if s == 0:
        return v
    return jnp.concatenate([v[:, s:], v[:, :s]], axis=1)


def _wavelet_fused_kernel(x_ref, masks, w1, b1, w2, b2, o_ref, p1, p2, *, width):
    # x_ref : (1, 4*Cin, H*W)   branch-stacked input, NC(HW) layout (spatial on lanes)
    # masks : (9, H*W)          1.0 where tap (kh, kw) reads in-bounds (implicit zero pad)
    # w1    : (4*Cout, 9*4*Cin) block-diagonal layer-1 weight, BN scale folded in
    # b1    : (4*Cout, 1)       folded layer-1 bias
    # w2    : (4*Cout, 9*4*Cout)
    # b2    : (4*Cout, 1)
    # o_ref : (1, 4*Cout, H*W)
    # p1/p2 : VMEM im2col scratch, (9*4*Cin, H*W) / (9*4*Cout, H*W)
    hw = o_ref.shape[-1]
    c1 = x_ref.shape[1]            # 4 * Cin  (branch-stacked input channels)
    c2 = o_ref.shape[1]            # 4 * Cout (branch-stacked output channels)

    x = x_ref[0]                   # (4*Cin, HW)
    m = masks[...]                 # (9, HW)

    # ---- layer 1: im2col via static lane-rolls + border masks, one fused GEMM ----
    for kh in range(3):
        for kw in range(3):
            t = kh * 3 + kw
            off = (kh - 1) * width + (kw - 1)
            p1[t * c1:(t + 1) * c1, :] = _lane_roll(x, off, hw) * m[t:t + 1, :]
    y1 = jnp.dot(w1[...], p1[...], preferred_element_type=jnp.float32)
    y1 = jnp.maximum(y1 + b1[...], 0.0)        # folded-BN bias + ReLU, stays on-chip

    # ---- layer 2: same, reading the VMEM-resident layer-1 activation -------------
    for kh in range(3):
        for kw in range(3):
            t = kh * 3 + kw
            off = (kh - 1) * width + (kw - 1)
            p2[t * c2:(t + 1) * c2, :] = _lane_roll(y1, off, hw) * m[t:t + 1, :]
    y2 = jnp.dot(w2[...], p2[...], preferred_element_type=jnp.float32)
    y2 = jnp.maximum(y2 + b2[...], 0.0)
    o_ref[0] = y2.astype(o_ref.dtype)


# --------------------------------------------------------------------------- #
# Parameter construction (Conv2d + BatchNorm2d folded, block-diagonal GEMM form)
# --------------------------------------------------------------------------- #
def _fold_conv_bn(key, cin, cout, ksize=3):
    """PyTorch-style Conv2d init + fresh BatchNorm2d, folded to (OIHW weight, bias)."""
    kw_key, kb_key = jax.random.split(key)
    fan_in = cin * ksize * ksize
    bound = 1.0 / np.sqrt(fan_in)
    w = jax.random.uniform(kw_key, (cout, cin, ksize, ksize),
                           minval=-bound, maxval=bound, dtype=jnp.float32)
    conv_b = jax.random.uniform(kb_key, (cout,), minval=-bound, maxval=bound,
                                dtype=jnp.float32)
    eps = 1e-5
    gamma = jnp.ones((cout,), jnp.float32)
    beta = jnp.zeros((cout,), jnp.float32)
    running_mean = jnp.zeros((cout,), jnp.float32)
    running_var = jnp.ones((cout,), jnp.float32)
    scale = gamma / jnp.sqrt(running_var + eps)
    w_folded = w * scale[:, None, None, None]          # BN scale folded into weights
    b_folded = beta + (conv_b - running_mean) * scale  # conv bias folded into BN bias
    return w_folded, b_folded


def _block_diag_weight(ws):
    """Stack 4 per-branch OIHW weights into a block-diagonal GEMM weight.

    Returns (4*Cout, KH*KW*4*Cin) with column order (tap, branch, cin) matching the
    kernel's im2col rows, and row order (branch, cout) matching torch.cat([...], 1).
    """
    n = len(ws)
    cout, cin, kh, kw = ws[0].shape
    blk = jnp.zeros((n * cout, kh * kw, n * cin), jnp.float32)
    for r, w in enumerate(ws):
        wr = jnp.transpose(w, (0, 2, 3, 1)).reshape(cout, kh * kw, cin)  # [co, tap, ci]
        blk = blk.at[r * cout:(r + 1) * cout, :, r * cin:(r + 1) * cin].set(wr)
    return blk.reshape(n * cout, kh * kw * n * cin)


def make_wavelet_params(key, in_channels, out_channels, kernel_size=3):
    keys = jax.random.split(key, 8)
    w1s, b1s, w2s, b2s = [], [], [], []
    k = 0
    for _branch in ("ll", "lh", "hl", "hh"):
        w, b = _fold_conv_bn(keys[k], in_channels, out_channels, kernel_size); k += 1
        w1s.append(w); b1s.append(b)
        w, b = _fold_conv_bn(keys[k], out_channels, out_channels, kernel_size); k += 1
        w2s.append(w); b2s.append(b)
    kernel_params = {
        "w1": _block_diag_weight(w1s),                 # (4*Cout, 9*4*Cin)
        "b1": jnp.concatenate(b1s).reshape(-1, 1),     # (4*Cout, 1)
        "w2": _block_diag_weight(w2s),                 # (4*Cout, 9*4*Cout)
        "b2": jnp.concatenate(b2s).reshape(-1, 1),     # (4*Cout, 1)
    }
    ref_params = {"w1": w1s, "b1": b1s, "w2": w2s, "b2": b2s}
    return kernel_params, ref_params


def _make_tap_masks(h, w, ksize=3, pad=1):
    """(ksize*ksize, h*w) float32: 1.0 where tap (kh, kw) reads in-bounds (numpy const)."""
    hs = np.arange(h * w) // w
    ws = np.arange(h * w) % w
    masks = np.zeros((ksize * ksize, h * w), np.float32)
    t = 0
    for kh in range(ksize):
        for kw in range(ksize):
            hh = hs + kh - pad
            ww = ws + kw - pad
            masks[t] = ((hh >= 0) & (hh < h) & (ww >= 0) & (ww < w)).astype(np.float32)
            t += 1
    return jnp.asarray(masks)


# --------------------------------------------------------------------------- #
# Full forward (single pallas_call)
# --------------------------------------------------------------------------- #
@jax.jit
def wavelet_conv2d(ll, lh, hl, hh, params):
    """Inputs NCHW (B, Cin, H, W); returns NCHW (B, 4*Cout, H, W) = cat([ll,lh,hl,hh], 1)."""
    B, Cin, H, W = ll.shape
    HW = H * W
    w1, b1, w2, b2 = params["w1"], params["b1"], params["w2"], params["b2"]
    C4, K1 = w1.shape            # 4*Cout, 9*4*Cin
    K2 = w2.shape[1]             # 9*4*Cout
    assert K1 == 9 * 4 * Cin and K2 == 9 * C4

    masks = _make_tap_masks(H, W)                                  # trace-time constant
    # Stack the 4 branches on the channel axis and flatten spatial (free trailing reshape).
    x = jnp.concatenate([ll, lh, hl, hh], axis=1).reshape(B, 4 * Cin, HW)

    out = pl.pallas_call(
        functools.partial(_wavelet_fused_kernel, width=W),
        out_shape=jax.ShapeDtypeStruct((B, C4, HW), ll.dtype),
        grid=(B,),
        in_specs=[
            pl.BlockSpec((1, 4 * Cin, HW), lambda b: (b, 0, 0)),   # stacked inputs
            pl.BlockSpec((9, HW), lambda b: (0, 0)),               # border masks
            pl.BlockSpec((C4, K1), lambda b: (0, 0)),              # layer-1 weight
            pl.BlockSpec((C4, 1), lambda b: (0, 0)),               # layer-1 bias
            pl.BlockSpec((C4, K2), lambda b: (0, 0)),              # layer-2 weight
            pl.BlockSpec((C4, 1), lambda b: (0, 0)),               # layer-2 bias
        ],
        out_specs=pl.BlockSpec((1, C4, HW), lambda b: (b, 0, 0)),
        scratch_shapes=[
            pltpu.VMEM((K1, HW), jnp.float32),                     # layer-1 im2col
            pltpu.VMEM((K2, HW), jnp.float32),                     # layer-2 im2col
        ],
        compiler_params=pltpu.CompilerParams(
            dimension_semantics=("parallel",),                     # batch -> megacore on v7x
        ),
    )(x, masks, w1, b1, w2, b2)

    return out.reshape(B, C4, H, W)


# --------------------------------------------------------------------------- #
# Pure-JAX reference (same folded params) for validation
# --------------------------------------------------------------------------- #
def _ref_conv_bn_relu(x, w, b):
    y = jax.lax.conv_general_dilated(
        x, w, window_strides=(1, 1), padding=((1, 1), (1, 1)),
        dimension_numbers=("NCHW", "OIHW", "NCHW"),
        precision=jax.lax.Precision.HIGHEST)
    return jnp.maximum(y + b[None, :, None, None], 0.0)


def wavelet_conv2d_reference(ll, lh, hl, hh, ref_params):
    outs = []
    for r, xin in enumerate((ll, lh, hl, hh)):
        y = _ref_conv_bn_relu(xin, ref_params["w1"][r], ref_params["b1"][r])
        y = _ref_conv_bn_relu(y, ref_params["w2"][r], ref_params["b2"][r])
        outs.append(y)
    return jnp.concatenate(outs, axis=1)


if __name__ == "__main__":
    B, Cin, Cout, H, W = 2, 4, 8, 16, 16

    key = jax.random.PRNGKey(0)
    k_ll, k_lh, k_hl, k_hh, k_params = jax.random.split(key, 5)
    ll = jax.random.normal(k_ll, (B, Cin, H, W), dtype=jnp.float32)
    lh = jax.random.normal(k_lh, (B, Cin, H, W), dtype=jnp.float32)
    hl = jax.random.normal(k_hl, (B, Cin, H, W), dtype=jnp.float32)
    hh = jax.random.normal(k_hh, (B, Cin, H, W), dtype=jnp.float32)

    kernel_params, ref_params = make_wavelet_params(k_params, Cin, Cout, kernel_size=3)

    out = wavelet_conv2d(ll, lh, hl, hh, kernel_params)
    out = jax.block_until_ready(out)

    assert out.shape == (B, 4 * Cout, H, W), out.shape

    ref = wavelet_conv2d_reference(ll, lh, hl, hh, ref_params)
    max_err = float(jnp.max(jnp.abs(out - ref)))
    assert max_err < 5e-2, f"mismatch vs reference: max_err={max_err}"

    print("KERNEL_OK")
</pallas_src>

<mosaic_0001>
module attributes {stable_mosaic.version = 11 : i64} {
  func.func @_wavelet_fused_kernel(%arg0: i32, %arg1: memref<1x16x256xf32, #tpu.memory_space<vmem>>, %arg2: memref<9x256xf32, #tpu.memory_space<vmem>>, %arg3: memref<32x144xf32, #tpu.memory_space<vmem>>, %arg4: memref<32x1xf32, #tpu.memory_space<vmem>>, %arg5: memref<32x288xf32, #tpu.memory_space<vmem>>, %arg6: memref<32x1xf32, #tpu.memory_space<vmem>>, %arg7: memref<1x32x256xf32, #tpu.memory_space<vmem>>, %arg8: memref<144x256xf32, #tpu.memory_space<vmem>>, %arg9: memref<288x256xf32, #tpu.memory_space<vmem>>) attributes {dimension_semantics = [#tpu.dimension_semantics<parallel>], iteration_bounds = array<i64: 2>, scalar_prefetch = 0 : i64, scratch_operands = 2 : i64, tpu.core_type = #tpu.core_type<tc>, window_params = [{transform_indices = @transform_0, window_bounds = array<i64: 1, 16, 256>}, {pipeline_mode = #tpu.pipeline_mode<synchronous>, transform_indices = @transform_1, window_bounds = array<i64: 9, 256>}, {pipeline_mode = #tpu.pipeline_mode<synchronous>, transform_indices = @transform_2, window_bounds = array<i64: 32, 144>}, {pipeline_mode = #tpu.pipeline_mode<synchronous>, transform_indices = @transform_3, window_bounds = array<i64: 32, 1>}, {pipeline_mode = #tpu.pipeline_mode<synchronous>, transform_indices = @transform_4, window_bounds = array<i64: 32, 288>}, {pipeline_mode = #tpu.pipeline_mode<synchronous>, transform_indices = @transform_5, window_bounds = array<i64: 32, 1>}, {transform_indices = @transform_6, window_bounds = array<i64: 1, 32, 256>}]} {
    %c0 = arith.constant 0 : index
    %c0_0 = arith.constant 0 : index
    %c0_1 = arith.constant 0 : index
    %0 = vector.load %arg1[%c0, %c0_0, %c0_1] : memref<1x16x256xf32, #tpu.memory_space<vmem>>, vector<1x16x256xf32>
    %1 = vector.shape_cast %0 : vector<1x16x256xf32> to vector<16x256xf32>
    %c0_2 = arith.constant 0 : index
    %c0_3 = arith.constant 0 : index
    %2 = vector.load %arg2[%c0_2, %c0_3] : memref<9x256xf32, #tpu.memory_space<vmem>>, vector<9x256xf32>
    %3 = vector.extract_strided_slice %1 {offsets = [0, 239], sizes = [16, 17], strides = [1, 1]} : vector<16x256xf32> to vector<16x17xf32>
    %4 = vector.extract_strided_slice %1 {offsets = [0, 0], sizes = [16, 239], strides = [1, 1]} : vector<16x256xf32> to vector<16x239xf32>
    %5 = tpu.concatenate %3, %4 in 1 : vector<16x17xf32>, vector<16x239xf32> -> vector<16x256xf32>
    %6 = vector.extract_strided_slice %2 {offsets = [0, 0], sizes = [1, 256], strides = [1, 1]} : vector<9x256xf32> to vector<1x256xf32>
    %7 = vector.broadcast %6 : vector<1x256xf32> to vector<16x256xf32>
    %8 = arith.mulf %5, %7 : vector<16x256xf32>
    %c0_4 = arith.constant 0 : index
    %c0_5 = arith.constant 0 : index
    %9 = vector.load %arg8[%c0_4, %c0_5] : memref<144x256xf32, #tpu.memory_space<vmem>>, vector<16x256xf32>
    tpu.vector_store %arg8[%c0_4, %c0_5], %8 {strides = array<i32>} : memref<144x256xf32, #tpu.memory_space<vmem>>, vector<16x256xf32>,
    %10 = vector.extract_strided_slice %1 {offsets = [0, 240], sizes = [16, 16], strides = [1, 1]} : vector<16x256xf32> to vector<16x16xf32>
    %11 = vector.extract_strided_slice %1 {offsets = [0, 0], sizes = [16, 240], strides = [1, 1]} : vector<16x256xf32> to vector<16x240xf32>
    %12 = tpu.concatenate %10, %11 in 1 : vector<16x16xf32>, vector<16x240xf32> -> vector<16x256xf32>
    %13 = vector.extract_strided_slice %2 {offsets = [1, 0], sizes = [1, 256], strides = [1, 1]} : vector<9x256xf32> to vector<1x256xf32>
    %14 = vector.broadcast %13 : vector<1x256xf32> to vector<16x256xf32>
    %15 = arith.mulf %12, %14 : vector<16x256xf32>
    %c16 = arith.constant 16 : index
    %c0_6 = arith.constant 0 : index
    %16 = vector.load %arg8[%c16, %c0_6] : memref<144x256xf32, #tpu.memory_space<vmem>>, vector<16x256xf32>
    tpu.vector_store %arg8[%c16, %c0_6], %15 {strides = array<i32>} : memref<144x256xf32, #tpu.memory_space<vmem>>, vector<16x256xf32>,
    %17 = vector.extract_strided_slice %1 {offsets = [0, 241], sizes = [16, 15], strides = [1, 1]} : vector<16x256xf32> to vector<16x15xf32>
    %18 = vector.extract_strided_slice %1 {offsets = [0, 0], sizes = [16, 241], strides = [1, 1]} : vector<16x256xf32> to vector<16x241xf32>
    %19 = tpu.concatenate %17, %18 in 1 : vector<16x15xf32>, vector<16x241xf32> -> vector<16x256xf32>
    %20 = vector.extract_strided_slice %2 {offsets = [2, 0], sizes = [1, 256], strides = [1, 1]} : vector<9x256xf32> to vector<1x256xf32>
    %21 = vector.broadcast %20 : vector<1x256xf32> to vector<16x256xf32>
    %22 = arith.mulf %19, %21 : vector<16x256xf32>
    %c32 = arith.constant 32 : index
    %c0_7 = arith.constant 0 : index
    %23 = vector.load %arg8[%c32, %c0_7] : memref<144x256xf32, #tpu.memory_space<vmem>>, vector<16x256xf32>
    tpu.vector_store %arg8[%c32, %c0_7], %22 {strides = array<i32>} : memref<144x256xf32, #tpu.memory_space<vmem>>, vector<16x256xf32>,
    %24 = vector.extract_strided_slice %1 {offsets = [0, 255], sizes = [16, 1], strides = [1, 1]} : vector<16x256xf32> to vector<16x1xf32>
    %25 = vector.extract_strided_slice %1 {offsets = [0, 0], sizes = [16, 255], strides = [1, 1]} : vector<16x256xf32> to vector<16x255xf32>
    %26 = tpu.concatenate %24, %25 in 1 : vector<16x1xf32>, vector<16x255xf32> -> vector<16x256xf32>
    %27 = vector.extract_strided_slice %2 {offsets = [3, 0], sizes = [1, 256], strides = [1, 1]} : vector<9x256xf32> to vector<1x256xf32>
    %28 = vector.broadcast %27 : vector<1x256xf32> to vector<16x256xf32>
    %29 = arith.mulf %26, %28 : vector<16x256xf32>
    %c48 = arith.constant 48 : index
    %c0_8 = arith.constant 0 : index
    %30 = vector.load %arg8[%c48, %c0_8] : memref<144x256xf32, #tpu.memory_space<vmem>>, vector<16x256xf32>
    tpu.vector_store %arg8[%c48, %c0_8], %29 {strides = array<i32>} : memref<144x256xf32, #tpu.memory_space<vmem>>, vector<16x256xf32>,
    %31 = vector.extract_strided_slice %2 {offsets = [4, 0], sizes = [1, 256], strides = [1, 1]} : vector<9x256xf32> to vector<1x256xf32>
    %32 = vector.broadcast %31 : vector<1x256xf32> to vector<16x256xf32>
    %33 = arith.mulf %1, %32 : vector<16x256xf32>
    %c64 = arith.constant 64 : index
    %c0_9 = arith.constant 0 : index
    %34 = vector.load %arg8[%c64, %c0_9] : memref<144x256xf32, #tpu.memory_space<vmem>>, vector<16x256xf32>
    tpu.vector_store %arg8[%c64, %c0_9], %33 {strides = array<i32>} : memref<144x256xf32, #tpu.memory_space<vmem>>, vector<16x256xf32>,
    %35 = vector.extract_strided_slice %1 {offsets = [0, 1], sizes = [16, 255], strides = [1, 1]} : vector<16x256xf32> to vector<16x255xf32>
    %36 = vector.extract_strided_slice %1 {offsets = [0, 0], sizes = [16, 1], strides = [1, 1]} : vector<16x256xf32> to vector<16x1xf32>
    %37 = tpu.concatenate %35, %36 in 1 : vector<16x255xf32>, vector<16x1xf32> -> vector<16x256xf32>
    %38 = vector.extract_strided_slice %2 {offsets = [5, 0], sizes = [1, 256], strides = [1, 1]} : vector<9x256xf32> to vector<1x256xf32>
    %39 = vector.broadcast %38 : vector<1x256xf32> to vector<16x256xf32>
    %40 = arith.mulf %37, %39 : vector<16x256xf32>
    %c80 = arith.constant 80 : index
    %c0_10 = arith.constant 0 : index
    %41 = vector.load %arg8[%c80, %c0_10] : memref<144x256xf32, #tpu.memory_space<vmem>>, vector<16x256xf32>
    tpu.vector_store %arg8[%c80, %c0_10], %40 {strides = array<i32>} : memref<144x256xf32, #tpu.memory_space<vmem>>, vector<16x256xf32>,
    %42 = vector.extract_strided_slice %1 {offsets = [0, 15], sizes = [16, 241], strides = [1, 1]} : vector<16x256xf32> to vector<16x241xf32>
    %43 = vector.extract_strided_slice %1 {offsets = [0, 0], sizes = [16, 15], strides = [1, 1]} : vector<16x256xf32> to vector<16x15xf32>
    %44 = tpu.concatenate %42, %43 in 1 : vector<16x241xf32>, vector<16x15xf32> -> vector<16x256xf32>
    %45 = vector.extract_strided_slice %2 {offsets = [6, 0], sizes = [1, 256], strides = [1, 1]} : vector<9x256xf32> to vector<1x256xf32>
    %46 = vector.broadcast %45 : vector<1x256xf32> to vector<16x256xf32>
    %47 = arith.mulf %44, %46 : vector<16x256xf32>
    %c96 = arith.constant 96 : index
    %c0_11 = arith.constant 0 : index
    %48 = vector.load %arg8[%c96, %c0_11] : memref<144x256xf32, #tpu.memory_space<vmem>>, vector<16x256xf32>
    tpu.vector_store %arg8[%c96, %c0_11], %47 {strides = array<i32>} : memref<144x256xf32, #tpu.memory_space<vmem>>, vector<16x256xf32>,
    %49 = vector.extract_strided_slice %1 {offsets = [0, 16], sizes = [16, 240], strides = [1, 1]} : vector<16x256xf32> to vector<16x240xf32>
    %50 = vector.extract_strided_slice %1 {offsets = [0, 0], sizes = [16, 16], strides = [1, 1]} : vector<16x256xf32> to vector<16x16xf32>
    %51 = tpu.concatenate %49, %50 in 1 : vector<16x240xf32>, vector<16x16xf32> -> vector<16x256xf32>
    %52 = vector.extract_strided_slice %2 {offsets = [7, 0], sizes = [1, 256], strides = [1, 1]} : vector<9x256xf32> to vector<1x256xf32>
    %53 = vector.broadcast %52 : vector<1x256xf32> to vector<16x256xf32>
    %54 = arith.mulf %51, %53 : vector<16x256xf32>
    %c112 = arith.constant 112 : index
    %c0_12 = arith.constant 0 : index
    %55 = vector.load %arg8[%c112, %c0_12] : memref<144x256xf32, #tpu.memory_space<vmem>>, vector<16x256xf32>
    tpu.vector_store %arg8[%c112, %c0_12], %54 {strides = array<i32>} : memref<144x256xf32, #tpu.memory_space<vmem>>, vector<16x256xf32>,
    %56 = vector.extract_strided_slice %1 {offsets = [0, 17], sizes = [16, 239], strides = [1, 1]} : vector<16x256xf32> to vector<16x239xf32>
    %57 = vector.extract_strided_slice %1 {offsets = [0, 0], sizes = [16, 17], strides = [1, 1]} : vector<16x256xf32> to vector<16x17xf32>
    %58 = tpu.concatenate %56, %57 in 1 : vector<16x239xf32>, vector<16x17xf32> -> vector<16x256xf32>
    %59 = vector.extract_strided_slice %2 {offsets = [8, 0], sizes = [1, 256], strides = [1, 1]} : vector<9x256xf32> to vector<1x256xf32>
    %60 = vector.broadcast %59 : vector<1x256xf32> to vector<16x256xf32>
    %61 = arith.mulf %58, %60 : vector<16x256xf32>
    %c128 = arith.constant 128 : index
    %c0_13 = arith.constant 0 : index
    %62 = vector.load %arg8[%c128, %c0_13] : memref<144x256xf32, #tpu.memory_space<vmem>>, vector<16x256xf32>
    tpu.vector_store %arg8[%c128, %c0_13], %61 {strides = array<i32>} : memref<144x256xf32, #tpu.memory_space<vmem>>, vector<16x256xf32>,
    %c0_14 = arith.constant 0 : index
    %c0_15 = arith.constant 0 : index
    %63 = vector.load %arg3[%c0_14, %c0_15] : memref<32x144xf32, #tpu.memory_space<vmem>>, vector<32x144xf32>
    %c0_16 = arith.constant 0 : index
    %c0_17 = arith.constant 0 : index
    %64 = vector.load %arg8[%c0_16, %c0_17] : memref<144x256xf32, #tpu.memory_space<vmem>>, vector<144x256xf32>
    %cst = arith.constant dense<0.000000e+00> : vector<32x256xf32>
    %65 = tpu.matmul %63, %64, %cst {dimension_numbers = #tpu.dot_dimension_numbers<[1], [0], [0], [1], [0, 0, 1, 1], [], []>} : vector<32x144xf32>, vector<144x256xf32>, vector<32x256xf32> -> vector<32x256xf32>
    %c0_18 = arith.constant 0 : index
    %c0_19 = arith.constant 0 : index
    %66 = vector.load %arg4[%c0_18, %c0_19] : memref<32x1xf32, #tpu.memory_space<vmem>>, vector<32x1xf32>
    %67 = vector.broadcast %66 : vector<32x1xf32> to vector<32x256xf32>
    %68 = arith.addf %65, %67 : vector<32x256xf32>
    %cst_20 = arith.constant 0.000000e+00 : f32
    %69 = vector.broadcast %cst_20 : f32 to vector<32x256xf32>
    %70 = arith.maximumf %68, %69 : vector<32x256xf32>
    %71 = vector.extract_strided_slice %70 {offsets = [0, 239], sizes = [32, 17], strides = [1, 1]} : vector<32x256xf32> to vector<32x17xf32>
    %72 = vector.extract_strided_slice %70 {offsets = [0, 0], sizes = [32, 239], strides = [1, 1]} : vector<32x256xf32> to vector<32x239xf32>
    %73 = tpu.concatenate %71, %72 in 1 : vector<32x17xf32>, vector<32x239xf32> -> vector<32x256xf32>
    %74 = vector.extract_strided_slice %2 {offsets = [0, 0], sizes = [1, 256], strides = [1, 1]} : vector<9x256xf32> to vector<1x256xf32>
    %75 = vector.broadcast %74 : vector<1x256xf32> to vector<32x256xf32>
    %76 = arith.mulf %73, %75 : vector<32x256xf32>
    %c0_21 = arith.constant 0 : index
    %c0_22 = arith.constant 0 : index
    %77 = vector.load %arg9[%c0_21, %c0_22] : memref<288x256xf32, #tpu.memory_space<vmem>>, vector<32x256xf32>
    tpu.vector_store %arg9[%c0_21, %c0_22], %76 {strides = array<i32>} : memref<288x256xf32, #tpu.memory_space<vmem>>, vector<32x256xf32>,
    %78 = vector.extract_strided_slice %70 {offsets = [0, 240], sizes = [32, 16], strides = [1, 1]} : vector<32x256xf32> to vector<32x16xf32>
    %79 = vector.extract_strided_slice %70 {offsets = [0, 0], sizes = [32, 240], strides = [1, 1]} : vector<32x256xf32> to vector<32x240xf32>
    %80 = tpu.concatenate %78, %79 in 1 : vector<32x16xf32>, vector<32x240xf32> -> vector<32x256xf32>
    %81 = vector.extract_strided_slice %2 {offsets = [1, 0], sizes = [1, 256], strides = [1, 1]} : vector<9x256xf32> to vector<1x256xf32>
    %82 = vector.broadcast %81 : vector<1x256xf32> to vector<32x256xf32>
    %83 = arith.mulf %80, %82 : vector<32x256xf32>
    %c32_23 = arith.constant 32 : index
    %c0_24 = arith.constant 0 : index
    %84 = vector.load %arg9[%c32_23, %c0_24] : memref<288x256xf32, #tpu.memory_space<vmem>>, vector<32x256xf32>
    tpu.vector_store %arg9[%c32_23, %c0_24], %83 {strides = array<i32>} : memref<288x256xf32, #tpu.memory_space<vmem>>, vector<32x256xf32>,
    %85 = vector.extract_strided_slice %70 {offsets = [0, 241], sizes = [32, 15], strides = [1, 1]} : vector<32x256xf32> to vector<32x15xf32>
    %86 = vector.extract_strided_slice %70 {offsets = [0, 0], sizes = [32, 241], strides = [1, 1]} : vector<32x256xf32> to vector<32x241xf32>
    %87 = tpu.concatenate %85, %86 in 1 : vector<32x15xf32>, vector<32x241xf32> -> vector<32x256xf32>
    %88 = vector.extract_strided_slice %2 {offsets = [2, 0], sizes = [1, 256], strides = [1, 1]} : vector<9x256xf32> to vector<1x256xf32>
    %89 = vector.broadcast %88 : vector<1x256xf32> to vector<32x256xf32>
    %90 = arith.mulf %87, %89 : vector<32x256xf32>
    %c64_25 = arith.constant 64 : index
    %c0_26 = arith.constant 0 : index
    %91 = vector.load %arg9[%c64_25, %c0_26] : memref<288x256xf32, #tpu.memory_space<vmem>>, vector<32x256xf32>
    tpu.vector_store %arg9[%c64_25, %c0_26], %90 {strides = array<i32>} : memref<288x256xf32, #tpu.memory_space<vmem>>, vector<32x256xf32>,
    %92 = vector.extract_strided_slice %70 {offsets = [0, 255], sizes = [32, 1], strides = [1, 1]} : vector<32x256xf32> to vector<32x1xf32>
    %93 = vector.extract_strided_slice %70 {offsets = [0, 0], sizes = [32, 255], strides = [1, 1]} : vector<32x256xf32> to vector<32x255xf32>
    %94 = tpu.concatenate %92, %93 in 1 : vector<32x1xf32>, vector<32x255xf32> -> vector<32x256xf32>
    %95 = vector.extract_strided_slice %2 {offsets = [3, 0], sizes = [1, 256], strides = [1, 1]} : vector<9x256xf32> to vector<1x256xf32>
    %96 = vector.broadcast %95 : vector<1x256xf32> to vector<32x256xf32>
    %97 = arith.mulf %94, %96 : vector<32x256xf32>
    %c96_27 = arith.constant 96 : index
    %c0_28 = arith.constant 0 : index
    %98 = vector.load %arg9[%c96_27, %c0_28] : memref<288x256xf32, #tpu.memory_space<vmem>>, vector<32x256xf32>
    tpu.vector_store %arg9[%c96_27, %c0_28], %97 {strides = array<i32>} : memref<288x256xf32, #tpu.memory_space<vmem>>, vector<32x256xf32>,
    %99 = vector.extract_strided_slice %2 {offsets = [4, 0], sizes = [1, 256], strides = [1, 1]} : vector<9x256xf32> to vector<1x256xf32>
    %100 = vector.broadcast %99 : vector<1x256xf32> to vector<32x256xf32>
    %101 = arith.mulf %70, %100 : vector<32x256xf32>
    %c128_29 = arith.constant 128 : index
    %c0_30 = arith.constant 0 : index
    %102 = vector.load %arg9[%c128_29, %c0_30] : memref<288x256xf32, #tpu.memory_space<vmem>>, vector<32x256xf32>
    tpu.vector_store %arg9[%c128_29, %c0_30], %101 {strides = array<i32>} : memref<288x256xf32, #tpu.memory_space<vmem>>, vector<32x256xf32>,
    %103 = vector.extract_strided_slice %70 {offsets = [0, 1], sizes = [32, 255], strides = [1, 1]} : vector<32x256xf32> to vector<32x255xf32>
    %104 = vector.extract_strided_slice %70 {offsets = [0, 0], sizes = [32, 1], strides = [1, 1]} : vector<32x256xf32> to vector<32x1xf32>
    %105 = tpu.concatenate %103, %104 in 1 : vector<32x255xf32>, vector<32x1xf32> -> vector<32x256xf32>
    %106 = vector.extract_strided_slice %2 {offsets = [5, 0], sizes = [1, 256], strides = [1, 1]} : vector<9x256xf32> to vector<1x256xf32>
    %107 = vector.broadcast %106 : vector<1x256xf32> to vector<32x256xf32>
    %108 = arith.mulf %105, %107 : vector<32x256xf32>
    %c160 = arith.constant 160 : index
    %c0_31 = arith.constant 0 : index
    %109 = vector.load %arg9[%c160, %c0_31] : memref<288x256xf32, #tpu.memory_space<vmem>>, vector<32x256xf32>
    tpu.vector_store %arg9[%c160, %c0_31], %108 {strides = array<i32>} : memref<288x256xf32, #tpu.memory_space<vmem>>, vector<32x256xf32>,
    %110 = vector.extract_strided_slice %70 {offsets = [0, 15], sizes = [32, 241], strides = [1, 1]} : vector<32x256xf32> to vector<32x241xf32>
    %111 = vector.extract_strided_slice %70 {offsets = [0, 0], sizes = [32, 15], strides = [1, 1]} : vector<32x256xf32> to vector<32x15xf32>
    %112 = tpu.concatenate %110, %111 in 1 : vector<32x241xf32>, vector<32x15xf32> -> vector<32x256xf32>
    %113 = vector.extract_strided_slice %2 {offsets = [6, 0], sizes = [1, 256], strides = [1, 1]} : vector<9x256xf32> to vector<1x256xf32>
    %114 = vector.broadcast %113 : vector<1x256xf32> to vector<32x256xf32>
    %115 = arith.mulf %112, %114 : vector<32x256xf32>
    %c192 = arith.constant 192 : index
    %c0_32 = arith.constant 0 : index
    %116 = vector.load %arg9[%c192, %c0_32] : memref<288x256xf32, #tpu.memory_space<vmem>>, vector<32x256xf32>
    tpu.vector_store %arg9[%c192, %c0_32], %115 {strides = array<i32>} : memref<288x256xf32, #tpu.memory_space<vmem>>, vector<32x256xf32>,
    %117 = vector.extract_strided_slice %70 {offsets = [0, 16], sizes = [32, 240], strides = [1, 1]} : vector<32x256xf32> to vector<32x240xf32>
    %118 = vector.extract_strided_slice %70 {offsets = [0, 0], sizes = [32, 16], strides = [1, 1]} : vector<32x256xf32> to vector<32x16xf32>
    %119 = tpu.concatenate %117, %118 in 1 : vector<32x240xf32>, vector<32x16xf32> -> vector<32x256xf32>
    %120 = vector.extract_strided_slice %2 {offsets = [7, 0], sizes = [1, 256], strides = [1, 1]} : vector<9x256xf32> to vector<1x256xf32>
    %121 = vector.broadcast %120 : vector<1x256xf32> to vector<32x256xf32>
    %122 = arith.mulf %119, %121 : vector<32x256xf32>
    %c224 = arith.constant 224 : index
    %c0_33 = arith.constant 0 : index
    %123 = vector.load %arg9[%c224, %c0_33] : memref<288x256xf32, #tpu.memory_space<vmem>>, vector<32x256xf32>
    tpu.vector_store %arg9[%c224, %c0_33], %122 {strides = array<i32>} : memref<288x256xf32, #tpu.memory_space<vmem>>, vector<32x256xf32>,
    %124 = vector.extract_strided_slice %70 {offsets = [0, 17], sizes = [32, 239], strides = [1, 1]} : vector<32x256xf32> to vector<32x239xf32>
    %125 = vector.extract_strided_slice %70 {offsets = [0, 0], sizes = [32, 17], strides = [1, 1]} : vector<32x256xf32> to vector<32x17xf32>
    %126 = tpu.concatenate %124, %125 in 1 : vector<32x239xf32>, vector<32x17xf32> -> vector<32x256xf32>
    %127 = vector.extract_strided_slice %2 {offsets = [8, 0], sizes = [1, 256], strides = [1, 1]} : vector<9x256xf32> to vector<1x256xf32>
    %128 = vector.broadcast %127 : vector<1x256xf32> to vector<32x256xf32>
    %129 = arith.mulf %126, %128 : vector<32x256xf32>
    %c256 = arith.constant 256 : index
    %c0_34 = arith.constant 0 : index
    %130 = vector.load %arg9[%c256, %c0_34] : memref<288x256xf32, #tpu.memory_space<vmem>>, vector<32x256xf32>
    tpu.vector_store %arg9[%c256, %c0_34], %129 {strides = array<i32>} : memref<288x256xf32, #tpu.memory_space<vmem>>, vector<32x256xf32>,
    %c0_35 = arith.constant 0 : index
    %c0_36 = arith.constant 0 : index
    %131 = vector.load %arg5[%c0_35, %c0_36] : memref<32x288xf32, #tpu.memory_space<vmem>>, vector<32x288xf32>
    %c0_37 = arith.constant 0 : index
    %c0_38 = arith.constant 0 : index
    %132 = vector.load %arg9[%c0_37, %c0_38] : memref<288x256xf32, #tpu.memory_space<vmem>>, vector<288x256xf32>
    %cst_39 = arith.constant dense<0.000000e+00> : vector<32x256xf32>
    %133 = tpu.matmul %131, %132, %cst_39 {dimension_numbers = #tpu.dot_dimension_numbers<[1], [0], [0], [1], [0, 0, 1, 1], [], []>} : vector<32x288xf32>, vector<288x256xf32>, vector<32x256xf32> -> vector<32x256xf32>
    %c0_40 = arith.constant 0 : index
    %c0_41 = arith.constant 0 : index
    %134 = vector.load %arg6[%c0_40, %c0_41] : memref<32x1xf32, #tpu.memory_space<vmem>>, vector<32x1xf32>
    %135 = vector.broadcast %134 : vector<32x1xf32> to vector<32x256xf32>
    %136 = arith.addf %133, %135 : vector<32x256xf32>
    %cst_42 = arith.constant 0.000000e+00 : f32
    %137 = vector.broadcast %cst_42 : f32 to vector<32x256xf32>
    %138 = arith.maximumf %136, %137 : vector<32x256xf32>
    %c0_43 = arith.constant 0 : index
    %c0_44 = arith.constant 0 : index
    %c0_45 = arith.constant 0 : index
    %139 = vector.load %arg7[%c0_43, %c0_44, %c0_45] : memref<1x32x256xf32, #tpu.memory_space<vmem>>, vector<1x32x256xf32>
    %140 = vector.shape_cast %139 : vector<1x32x256xf32> to vector<32x256xf32>
    %141 = vector.shape_cast %138 : vector<32x256xf32> to vector<1x32x256xf32>
    tpu.vector_store %arg7[%c0_43, %c0_44, %c0_45], %141 {strides = array<i32>} : memref<1x32x256xf32, #tpu.memory_space<vmem>>, vector<1x32x256xf32>,
    return
  }
  func.func @transform_0(%arg0: i32) -> (i32, i32, i32) {
    %c0_i32 = arith.constant 0 : i32
    %c0_i32_0 = arith.constant 0 : i32
    %c0_i32_1 = arith.constant 0 : i32
    return %arg0, %c0_i32, %c0_i32_0 : i32, i32, i32
  }
  func.func @transform_1(%arg0: i32) -> (i32, i32) {
    %c0_i32 = arith.constant 0 : i32
    %c0_i32_0 = arith.constant 0 : i32
    %c0_i32_1 = arith.constant 0 : i32
    return %c0_i32, %c0_i32_0 : i32, i32
  }
  func.func @transform_2(%arg0: i32) -> (i32, i32) {
    %c0_i32 = arith.constant 0 : i32
    %c0_i32_0 = arith.constant 0 : i32
    %c0_i32_1 = arith.constant 0 : i32
    return %c0_i32, %c0_i32_0 : i32, i32
  }
  func.func @transform_3(%arg0: i32) -> (i32, i32) {
    %c0_i32 = arith.constant 0 : i32
    %c0_i32_0 = arith.constant 0 : i32
    %c0_i32_1 = arith.constant 0 : i32
    return %c0_i32, %c0_i32_0 : i32, i32
  }
  func.func @transform_4(%arg0: i32) -> (i32, i32) {
    %c0_i32 = arith.constant 0 : i32
    %c0_i32_0 = arith.constant 0 : i32
    %c0_i32_1 = arith.constant 0 : i32
    return %c0_i32, %c0_i32_0 : i32, i32
  }
  func.func @transform_5(%arg0: i32) -> (i32, i32) {
    %c0_i32 = arith.constant 0 : i32
    %c0_i32_0 = arith.constant 0 : i32
    %c0_i32_1 = arith.constant 0 : i32
    return %c0_i32, %c0_i32_0 : i32, i32
  }
  func.func @transform_6(%arg0: i32) -> (i32, i32, i32) {
    %c0_i32 = arith.constant 0 : i32
    %c0_i32_0 = arith.constant 0 : i32
    %c0_i32_1 = arith.constant 0 : i32
    return %arg0, %c0_i32, %c0_i32_0 : i32, i32, i32
  }
}

</mosaic_0001>

<bundles_post_ra>
// kernel: wavelet_conv2d.1
= control target key start
LH: loop header
LB: loop body
LE: loop exit
PB: predicated region body
PF: predicated region fallthrough
CT: control target
= control target key end

     0   :  { %s1767_s21 = smov 0   ;;  %s2491_s0 = inlined_call_operand.vmem [shape: f32[2,16,256], index: 0, kind: input, shape index: {}]   ;;  %s2492_s1 = inlined_call_operand.vmem [shape: f32[9,256], index: 1, kind: input, shape index: {}]   ;;  %s2493_s2 = inlined_call_operand.vmem [shape: f32[32,144], index: 2, kind: input, shape index: {}]   ;;  %s2494_s3 = inlined_call_operand.vmem [shape: f32[32,1], index: 3, kind: input, shape index: {}]   ;;  %s2495_s4 = inlined_call_operand.vmem [shape: f32[32,288], index: 4, kind: input, shape index: {}]   ;;  %s2496_s5 = inlined_call_operand.vmem [shape: f32[32,1], index: 5, kind: input, shape index: {}]   ;;  %s2497_s6 = inlined_call_operand.vmem [shape: f32[2,32,256], index: 6, kind: output, shape index: {}]  }
   0x1 LB: > { %s1547_s22 = sadd.s32 4294967295, %s1720_s21   ;;  %p1551_p0 = scmp.ge.s32.totalorder %s1720_s21, 1  ;;  %s1720_s21 = sphi %s1767_s21, %s16_s21  }
   0x2   : > { %p212_p1 = scmp.lt.s32.totalorder %s1720_s21, 3 }
   0x4   : > { %p213_p2 = pnand %p1551_p0, %p212_p1 }
   0x6   : > { %216 = sbr.rel (%p213_p2) target bundleno = 898 (0x382), region = 44 }
   0xd   : > { %p242_p3 = scmp.lt.s32.totalorder %s1547_s22, 1  ;;  %s1722_s27 = smov 17   ;;  %v283_v4 = vlaneseq  ;;  %v1797_v7 = vld [vmem:[%s2492_s1 + $0x8] sm:$0xff]  ;;  %v1802_v8 = vld [vmem:[%s2492_s1] sm:$0xff]  ;;  %vm309_vm0 = vcmask 130048   ;;  %v1730_v20 = vmov 0  }
   0xe   : > { %s1723_s28 = smov 16   ;;  %s1724_s29 = smov 15   ;;  %v561_v17 = vld [vmem:[%s2493_s2 + $0x8] sm:$0xff]  ;;  %v604_v18 = vld [vmem:[%s2494_s3] sm:$0xff]  ;;  %1712 = vset.pattern.permute.xlu0 %v1730_v20  ;;  %1713 = vset.pattern.permute.xlu1 %v1730_v20  ;;  %v607_v21 = vld [vmem:[%s2494_s3 + $0x18] sm:$0xff]  ;;  %vm274_vm1 = vcmask 138240  }
   0xf   : > { %s2525_s22 = smov (!%p242_p3, %s1547_s22), 1  ;;  %v1789_v5 = vshrl.u32 %v283_v4, 7  ;;  %s1725_s10 = smov 1   ;;  %1558 = vmatprep.mubr.msk.f32.mxu0 %vm309_vm0, %v561_v17  ;;  %v605_v19 = vld [vmem:[%s2494_s3 + $0x8] sm:$0xff]  ;;  %v606_v22 = vld [vmem:[%s2494_s3 + $0x10] sm:$0xff]  ;;  %vm344_vm2 = vcmask 121856  }
  0x10   : > { %s1568_s23 = sshll.u32 %s2525_s22, 5  ;;  %s1726_s11 = smov 127   ;;  %vm379_vm3 = vcmask 7168   ;;  %vm428_vm4 = vcmask 1039360   ;;  %vm463_vm5 = vcmask 924672   ;;  %vm498_vm6 = vcmask 916480  }
  0x11   : > { %s246_s26 = scalar_lea.vmem %s2491_s0, %s1568_s23  ;;  %v406_v6 = vsub.s32 4, %v1789_v5  ;;  %s1727_s12 = smov 113   ;;  %v285_v23 = vsub.s32 0, %v1789_v5  ;;  %v320_v34 = vsub.s32 1, %v1789_v5  ;;  %v355_v47 = vsub.s32 2, %v1789_v5 }
  0x12   : > { %v253_v0 = vld [vmem:[%s246_s26 + $0x8] sm:$0xff]  ;;  %v252_v1 = vld [vmem:[%s246_s26] sm:$0xff]  ;;  %v255_v2 = vld [vmem:[%s246_s26 + $0x18] sm:$0xff]  ;;  %s1728_s13 = smov 112   ;;  %s1729_s16 = smov 111   ;;  %vm533_vm7 = vcmask 908288  }
  0x13   : > { %262 = vrot.lane.b32.xlu0 %v253_v0, %s1722_s27  ;;  %270 = vrot.lane.b32.xlu1 %v252_v1, %s1722_s27  ;;  %v254_v3 = vld [vmem:[%s246_s26 + $0x10] sm:$0xff]  ;;  %v1805_v9 = vrot.slane %v1797_v7, %v406_v6  ;;  %v1808_v10 = vrot.slane %v1802_v8, %v406_v6  ;;  %v1866_v26 = vrot.slane %v1797_v7, %v285_v23  ;;  %vm1285_vm8 = vcmask 261120   ;;  %s1569_s17 = sshll.u32 %s2525_s22, 6 }
  0x14   : > { %v1869_v27 = vrot.slane %v1802_v8, %v285_v23  ;;  %v1881_v43 = vrot.slane %v1802_v8, %v320_v34  ;;  %v1884_v44 = vrot.slane %v1797_v7, %v320_v34  ;;  %v1896_v60 = vrot.slane %v1802_v8, %v355_v47  ;;  %s2478_s20 = scalar_lea.vmem %s2497_s6, %s1569_s17 }
  0x15   : > { %v1813_v11 = vmul.f32 %v1805_v9, %v253_v0  ;;  %v1816_v12 = vmul.f32 %v1805_v9, %v255_v2  ;;  %v1819_v13 = vmul.f32 %v1808_v10, %v252_v1  ;;  %v1822_v14 = vmul.f32 %v1808_v10, %v254_v3 }
  0x16   : > { %v1899_v61 = vrot.slane %v1797_v7, %v355_v47 }
  0x17   : > { %264 = vrot.lane.b32.xlu0 %v255_v2, %s1722_s27  ;;  %272 = vrot.lane.b32.xlu1 %v254_v3, %s1722_s27  ;;  %v1586_v15 = vpack.c.bf16 %v1816_v12, %v1813_v11  ;;  %v1588_v16 = vpack.c.bf16 %v1822_v14, %v1819_v13 }
  0x1b   : > { %299 = vrot.lane.b32.xlu0 %v253_v0, %s1723_s28  ;;  %301 = vrot.lane.b32.xlu1 %v255_v2, %s1723_s28 }
  0x1f   : > { %305 = vrot.lane.b32.xlu0 %v252_v1, %s1723_s28  ;;  %307 = vrot.lane.b32.xlu1 %v254_v3, %s1723_s28 }
  0x23   : > { %334 = vrot.lane.b32.xlu0 %v253_v0, %s1724_s29  ;;  %336 = vrot.lane.b32.xlu1 %v255_v2, %s1724_s29 }
  0x27   : > { %340 = vrot.lane.b32.xlu0 %v252_v1, %s1724_s29  ;;  %342 = vrot.lane.b32.xlu1 %v254_v3, %s1724_s29 }
  0x2b   : > { %369 = vrot.lane.b32.xlu0 %v253_v0, %s1725_s10  ;;  %371 = vrot.lane.b32.xlu1 %v255_v2, %s1725_s10 }
  0x2f   : > { %375 = vrot.lane.b32.xlu0 %v252_v1, %s1725_s10  ;;  %377 = vrot.lane.b32.xlu1 %v254_v3, %s1725_s10 }
  0x33   : > { %420 = vrot.lane.b32.xlu0 %v252_v1, %s1726_s11  ;;  %422 = vrot.lane.b32.xlu1 %v253_v0, %s1726_s11 }
  0x37   : > { %424 = vrot.lane.b32.xlu0 %v254_v3, %s1726_s11  ;;  %426 = vrot.lane.b32.xlu1 %v255_v2, %s1726_s11 }
  0x3b   : > { %455 = vrot.lane.b32.xlu0 %v252_v1, %s1727_s12  ;;  %457 = vrot.lane.b32.xlu1 %v253_v0, %s1727_s12 }
  0x3f   : > { %459 = vrot.lane.b32.xlu0 %v254_v3, %s1727_s12  ;;  %461 = vrot.lane.b32.xlu1 %v255_v2, %s1727_s12 }
  0x43   : > { %490 = vrot.lane.b32.xlu0 %v252_v1, %s1728_s13  ;;  %492 = vrot.lane.b32.xlu1 %v253_v0, %s1728_s13 }
  0x47   : > { %494 = vrot.lane.b32.xlu0 %v254_v3, %s1728_s13  ;;  %496 = vrot.lane.b32.xlu1 %v255_v2, %s1728_s13 }
  0x4b   : > { %525 = vrot.lane.b32.xlu0 %v252_v1, %s1729_s16  ;;  %527 = vrot.lane.b32.xlu1 %v253_v0, %s1729_s16  ;;  %v390_v0 = vsub.s32 3, %v1789_v5 }
  0x4f   : > { %529 = vrot.lane.b32.xlu0 %v254_v3, %s1729_s16  ;;  %531 = vrot.lane.b32.xlu1 %v255_v2, %s1729_s16 }
  0x53   : > { %610 = vperm.xlu0 %1712, %v604_v18   ;;  %615 = vperm.xlu1 %1713, %v605_v19  }
  0x57   : > { %625 = vperm.xlu0 %1712, %v607_v21   ;;  %620 = vperm.xlu1 %1713, %v606_v22  }
  0x85   : > { %v263_v24 = vpop.permute.xlu0 %262  ;;  %v271_v25 = vpop.permute.xlu1 %270 }
  0x86   : > { %v281_v28 = vsel %vm274_vm1, %v263_v24, %v271_v25  ;;  %v275_v29 = vsel %vm274_vm1, %v271_v25, %v263_v24  ;;  %v1911_v24 = vrot.slane %v1802_v8, %v390_v0  ;;  %v1914_v25 = vrot.slane %v1797_v7, %v390_v0 }
  0x87   : > { %v292_v35 = vmul.f32 %v1866_v26, %v275_v29  ;;  %v291_v37 = vmul.f32 %v1869_v27, %v281_v28 }
  0x89   : > { %v265_v30 = vpop.permute.xlu0 %264  ;;  %v273_v31 = vpop.permute.xlu1 %272 }
  0x8a   : > { %v282_v32 = vsel %vm274_vm1, %v265_v30, %v273_v31  ;;  %v276_v33 = vsel %vm274_vm1, %v273_v31, %v265_v30  ;;  %v441_v30 = vsub.s32 5, %v1789_v5 }
  0x8b   : > { %v294_v36 = vmul.f32 %v1866_v26, %v276_v33  ;;  %v293_v38 = vmul.f32 %v1869_v27, %v282_v32 }
  0x8d   : > { %v300_v39 = vpop.permute.xlu0 %299  ;;  %v302_v40 = vpop.permute.xlu1 %301  ;;  %v1570_v41 = vpack.c.bf16 %v294_v36, %v292_v35  ;;  %v1572_v42 = vpack.c.bf16 %v293_v38, %v291_v37 }
  0x8f   : > { %1571 = vmatprep.subr.bf16.mxu0 %v1570_v41 }
  0x90   : > { %1573 = vmatpush1.bf16.msra.mxu0 %v1572_v42 }
  0x91   : > { %v306_v45 = vpop.permute.xlu0 %305  ;;  %v308_v46 = vpop.permute.xlu1 %307 }
  0x92   : > { %v310_v48 = vsel %vm309_vm0, %v306_v45, %v300_v39  ;;  %v316_v49 = vsel %vm309_vm0, %v300_v39, %v306_v45  ;;  %v311_v50 = vsel %vm309_vm0, %v308_v46, %v302_v40  ;;  %v317_v51 = vsel %vm309_vm0, %v302_v40, %v308_v46 }
  0x93   : > { %v326_v52 = vmul.f32 %v1881_v43, %v316_v49  ;;  %v327_v53 = vmul.f32 %v1884_v44, %v310_v48  ;;  %v328_v54 = vmul.f32 %v1881_v43, %v317_v51  ;;  %v329_v55 = vmul.f32 %v1884_v44, %v311_v50 }
  0x94   : > { %v1926_v45 = vrot.slane %v1802_v8, %v441_v30  ;;  %v1929_v46 = vrot.slane %v1797_v7, %v441_v30 }
  0x95   : > { %v335_v56 = vpop.permute.xlu0 %334  ;;  %v337_v57 = vpop.permute.xlu1 %336  ;;  %v1574_v58 = vpack.c.bf16 %v329_v55, %v327_v53  ;;  %v1576_v59 = vpack.c.bf16 %v328_v54, %v326_v52  ;;  %v476_v53 = vsub.s32 6, %v1789_v5 }
  0x97   : > { %1575 = vmatprep.subr.bf16.mxu0 %v1574_v58 }
  0x98   : > { %1577 = vmatpush1.bf16.msra.mxu0 %v1576_v59  ;;  %v1947_v59 = vrot.slane %v1802_v8, %v476_v53 }
  0x99   : > { %v341_v62 = vpop.permute.xlu0 %340  ;;  %v343_v63 = vpop.permute.xlu1 %342 }
  0x9a   : > { %v345_v1 = vsel %vm344_vm2, %v341_v62, %v335_v56  ;;  %v351_v2 = vsel %vm344_vm2, %v335_v56, %v341_v62  ;;  %v346_v3 = vsel %vm344_vm2, %v343_v63, %v337_v57  ;;  %v352_v4 = vsel %vm344_vm2, %v337_v57, %v343_v63  ;;  %2510 = vst [vmem:[#allocation4_spill] sm:$0xff] %v1947_v59 }
  0x9b   : > { %v361_v6 = vmul.f32 %v1896_v60, %v351_v2  ;;  %v362_v17 = vmul.f32 %v1899_v61, %v345_v1  ;;  %v363_v18 = vmul.f32 %v1896_v60, %v352_v4  ;;  %v364_v19 = vmul.f32 %v1899_v61, %v346_v3 }
  0x9c   : > { %v1950_v62 = vrot.slane %v1797_v7, %v476_v53  ;;  %v511_v2 = vsub.s32 7, %v1789_v5 }
  0x9d   : > { %v370_v20 = vpop.permute.xlu0 %369  ;;  %v372_v21 = vpop.permute.xlu1 %371  ;;  %v1578_v22 = vpack.c.bf16 %v364_v19, %v362_v17  ;;  %v1580_v23 = vpack.c.bf16 %v363_v18, %v361_v6 }
  0x9f   : > { %1579 = vmatprep.subr.bf16.mxu0 %v1578_v22  ;;  %v1962_v22 = vrot.slane %v1802_v8, %v511_v2 }
  0xa0   : > { %1581 = vmatpush1.bf16.msra.mxu0 %v1580_v23  ;;  %v1965_v23 = vrot.slane %v1797_v7, %v511_v2 }
  0xa1   : > { %v376_v28 = vpop.permute.xlu0 %375  ;;  %v378_v29 = vpop.permute.xlu1 %377  ;;  %2511 = vst [vmem:[#allocation5_spill] sm:$0xff] %v1962_v22 }
  0xa2   : > { %v380_v31 = vsel %vm379_vm3, %v376_v28, %v370_v20  ;;  %v386_v32 = vsel %vm379_vm3, %v370_v20, %v376_v28  ;;  %v381_v33 = vsel %vm379_vm3, %v378_v29, %v372_v21  ;;  %v387_v34 = vsel %vm379_vm3, %v372_v21, %v378_v29  ;;  %2512 = vst [vmem:[#allocation6_spill] sm:$0xff] %v1965_v23 }
  0xa3   : > { %v396_v35 = vmul.f32 %v1911_v24, %v386_v32  ;;  %v397_v36 = vmul.f32 %v1914_v25, %v380_v31  ;;  %v398_v37 = vmul.f32 %v1911_v24, %v387_v34  ;;  %v399_v38 = vmul.f32 %v1914_v25, %v381_v33 }
  0xa5   : > { %v421_v39 = vpop.permute.xlu0 %420  ;;  %v423_v40 = vpop.permute.xlu1 %422  ;;  %v1582_v41 = vpack.c.bf16 %v399_v38, %v397_v36  ;;  %v1584_v42 = vpack.c.bf16 %v398_v37, %v396_v35 }
  0xa6   : > { %v429_v47 = vsel %vm428_vm4, %v421_v39, %v423_v40  ;;  %v437_v48 = vsel %vm428_vm4, %v423_v40, %v421_v39  ;;  %v1978_v39 = vld [vmem:[%s2492_s1 + $0x10] ss:$0 sm:$0xff]  ;;  %v1983_v40 = vld [vmem:[%s2492_s1 + $0x18] ss:$0 sm:$0xff] }
  0xa7   : > { %1583 = vmatprep.subr.bf16.mxu0 %v1582_v41  ;;  %v447_v54 = vmul.f32 %v1926_v45, %v429_v47  ;;  %v448_v55 = vmul.f32 %v1929_v46, %v437_v48  ;;  %2513 = vst [vmem:[#allocation7_spill] sm:$0xff] %v1978_v39  ;;  %2514 = vst [vmem:[#allocation8_spill] sm:$0xff] %v1983_v40 }
  0xa8   : > { %1585 = vmatpush1.bf16.msra.mxu0 %v1584_v42 }
  0xa9   : > { %v425_v49 = vpop.permute.xlu0 %424  ;;  %v427_v50 = vpop.permute.xlu1 %426  ;;  %1587 = vmatprep.subr.bf16.mxu0 %v1586_v15 }
  0xaa   : > { %v430_v51 = vsel %vm428_vm4, %v425_v49, %v427_v50  ;;  %v438_v52 = vsel %vm428_vm4, %v427_v50, %v425_v49 }
  0xab   : > { %v449_v56 = vmul.f32 %v1926_v45, %v430_v51  ;;  %v450_v57 = vmul.f32 %v1929_v46, %v438_v52 }
  0xac   : > { %1589 = vmatpush1.bf16.msra.mxu0 %v1588_v16 }
  0xad   : > { %v456_v11 = vpop.permute.xlu0 %455  ;;  %v458_v12 = vpop.permute.xlu1 %457  ;;  %v1590_v15 = vpack.c.bf16 %v450_v57, %v448_v55  ;;  %v1592_v58 = vpack.c.bf16 %v449_v56, %v447_v54  ;;  %v560_v57 = vld [vmem:[%s2493_s2] sm:$0xff] }
  0xae   : > { %v464_v63 = vsel %vm463_vm5, %v456_v11, %v458_v12  ;;  %v472_v0 = vsel %vm463_vm5, %v458_v12, %v456_v11  ;;  %v563_v11 = vld [vmem:[%s2493_s2 + $0x18] sm:$0xff]  ;;  %v562_v12 = vld [vmem:[%s2493_s2 + $0x10] sm:$0xff] }
  0xaf   : > { %1591 = vmatprep.subr.bf16.mxu0 %v1590_v15  ;;  %v482_v3 = vmul.f32 %v1947_v59, %v464_v63  ;;  %v483_v4 = vmul.f32 %v1950_v62, %v472_v0  ;;  %v565_v15 = vld [vmem:[%s2493_s2 + $0x28] sm:$0xff]  ;;  %v567_v63 = vld [vmem:[%s2493_s2 + $0x38] sm:$0xff]  ;;  %v566_v0 = vld [vmem:[%s2493_s2 + $0x30] sm:$0xff] }
  0xb0   : > { %1593 = vmatpush1.bf16.msra.mxu0 %v1592_v58  ;;  %v564_v58 = vld [vmem:[%s2493_s2 + $0x20] sm:$0xff] }
  0xb1   : > { %v460_v1 = vpop.permute.xlu0 %459  ;;  %v462_v13 = vpop.permute.xlu1 %461 }
  0xb2   : > { %v465_v14 = vsel %vm463_vm5, %v460_v1, %v462_v13  ;;  %v473_v16 = vsel %vm463_vm5, %v462_v13, %v460_v1 }
  0xb3   : > { %v484_v6 = vmul.f32 %v1947_v59, %v465_v14  ;;  %v485_v17 = vmul.f32 %v1950_v62, %v473_v16 }
  0xb5   : > { %v491_v18 = vpop.permute.xlu0 %490  ;;  %v493_v19 = vpop.permute.xlu1 %492  ;;  %v1594_v20 = vpack.c.bf16 %v485_v17, %v483_v4  ;;  %v1596_v21 = vpack.c.bf16 %v484_v6, %v482_v3 }
  0xb6   : > { %v499_v5 = vsel %vm498_vm6, %v491_v18, %v493_v19  ;;  %v507_v28 = vsel %vm498_vm6, %v493_v19, %v491_v18 }
  0xb7   : > { %1595 = vmatprep.subr.bf16.mxu0 %v1594_v20  ;;  %v517_v33 = vmul.f32 %v1962_v22, %v499_v5  ;;  %v518_v8 = vmul.f32 %v1965_v23, %v507_v28 }
  0xb8   : > { %1597 = vmatpush1.bf16.msra.mxu0 %v1596_v21 }
  0xb9   : > { %v495_v29 = vpop.permute.xlu0 %494  ;;  %v497_v30 = vpop.permute.xlu1 %496 }
  0xba   : > { %v500_v31 = vsel %vm498_vm6, %v495_v29, %v497_v30  ;;  %v508_v32 = vsel %vm498_vm6, %v497_v30, %v495_v29 }
  0xbb   : > { %v519_v34 = vmul.f32 %v1962_v22, %v500_v31  ;;  %v520_v7 = vmul.f32 %v1965_v23, %v508_v32 }
  0xbd   : > { %v526_v35 = vpop.permute.xlu0 %525  ;;  %v528_v36 = vpop.permute.xlu1 %527  ;;  %v1598_v37 = vpack.c.bf16 %v520_v7, %v518_v8  ;;  %v1600_v38 = vpack.c.bf16 %v519_v34, %v517_v33 }
  0xbe   : > { %v534_v41 = vsel %vm533_vm7, %v526_v35, %v528_v36  ;;  %v542_v42 = vsel %vm533_vm7, %v528_v36, %v526_v35 }
  0xbf   : > { %1599 = vmatprep.subr.bf16.mxu0 %v1598_v37  ;;  %v552_v51 = vmul.f32 %v1978_v39, %v534_v41  ;;  %v553_v52 = vmul.f32 %v1983_v40, %v542_v42 }
  0xc0   : > { %1601 = vmatpush1.bf16.msra.mxu0 %v1600_v38 }
  0xc1   : > { %v530_v47 = vpop.permute.xlu0 %529  ;;  %v532_v48 = vpop.permute.xlu1 %531 }
  0xc2   : > { %v535_v49 = vsel %vm533_vm7, %v530_v47, %v532_v48  ;;  %v543_v50 = vsel %vm533_vm7, %v532_v48, %v530_v47  ;;  %v1178_v48 = vld [vmem:[%s2495_s4 + $0x8] sm:$0xff] }
  0xc3   : > { %v554_v53 = vmul.f32 %v1978_v39, %v535_v49  ;;  %v555_v54 = vmul.f32 %v1983_v40, %v543_v50  ;;  %1362 = vmatprep.mubr.f32.mxu1 %v1178_v48 }
  0xc5   : > { %v1602_v55 = vpack.c.bf16 %v555_v54, %v553_v52  ;;  %v1604_v56 = vpack.c.bf16 %v554_v53, %v552_v51  ;;  %v2498_v51 = vmov 0.0   ;;  %v1261_v54 = vld [vmem:[%s2496_s5] sm:$0xff] }
  0xc7   : > { %1603 = vmatprep.subr.bf16.mxu0 %v1602_v55 }
  0xc8   : > { %1605 = vmatpush1.bf16.msra.mxu0 %v1604_v56  ;;  %v1262_v56 = vld [vmem:[%s2496_s5 + $0x8] sm:$0xff] }
  0xcb   : > { %705 = vmatmul.mubr.f32.vlgmr.msra.gmra.mrb[0].mxu0 %v560_v57 }
  0xcc   : > { %1559 = vmatprep.mubr.msk.f32.mxu0 %vm309_vm0, %v563_v11  ;;  %v1263_v11 = vld [vmem:[%s2496_s5 + $0x10] sm:$0xff] }
  0xcf   : > { %711 = vmatmul.mubr.f32.gmra.mrb[2].mxu0 %v562_v12 }
  0xd0   : > { %1560 = vmatprep.mubr.msk.f32.mxu0 %vm309_vm0, %v565_v15  ;;  %v1264_v15 = vld [vmem:[%s2496_s5 + $0x18] sm:$0xff] }
  0xd2   : > { %v611_v1 = vpop.permute.xlu0 %610  ;;  %v616_v17 = vpop.permute.xlu1 %615 }
  0xd3   : > { %717 = vmatmul.mubr.f32.gmra.mrb[4].mxu0 %v564_v58 }
  0xd4   : > { %1561 = vmatprep.mubr.msk.f32.mxu0 %vm309_vm0, %v567_v63 }
  0xd6   : > { %v621_v32 = vpop.permute.xlu1 %620  ;;  %v626_v34 = vpop.permute.xlu0 %625 }
  0xd7   : > { %723 = vmatmul.mubr.f32.gmra.mrb[6].mxu0 %v566_v0 }
  0xd8   : > { %1451 = vmatprep.mubr.f32.mxu0 %v2498_v51 }
 0x19e   : > { %v706_v13 = vpop.f32.mrb[0].mxu0 }
 0x19f   : > { %v707_v14 = vadd.f32 %v706_v13, %v611_v1  ;;  %v708_v16 = vpop.f32.mrb[1].mxu0 }
 0x1a0   : > { %v709_v2 = vadd.f32 %v708_v16, %v611_v1 }
 0x1a1   : > { %v2017_v3 = vmax.f32 %v707_v14, 0.0 }
 0x1a2   : > { %v2019_v4 = vmax.f32 %v709_v2, 0.0  ;;  %v712_v6 = vpop.f32.mrb[2].mxu0 }
 0x1a3   : > { %v714_v18 = vpop.f32.mrb[3].mxu0  ;;  %757 = vrot.lane.b32.xlu1 %v2017_v3, %s1722_s27  ;;  %v713_v19 = vadd.f32 %v712_v6, %v616_v17 }
 0x1a4   : > { %971 = vrot.lane.b32.xlu0 %v2019_v4, %s1726_s11  ;;  %v715_v30 = vadd.f32 %v714_v18, %v616_v17 }
 0x1a5   : > { %v2029_v5 = vmax.f32 %v713_v19, 0.0 }
 0x1a6   : > { %v718_v20 = vpop.f32.mrb[4].mxu0  ;;  %v2047_v31 = vmax.f32 %v715_v30, 0.0 }
 0x1a7   : > { %v720_v21 = vpop.f32.mrb[5].mxu0  ;;  %809 = vrot.lane.b32.xlu1 %v2017_v3, %s1723_s28  ;;  %v719_v33 = vadd.f32 %v718_v20, %v621_v32 }
 0x1a8   : > { %1023 = vrot.lane.b32.xlu0 %v2019_v4, %s1727_s12  ;;  %v721_v8 = vadd.f32 %v720_v21, %v621_v32 }
 0x1a9   : > { %v2069_v7 = vmax.f32 %v719_v33, 0.0 }
 0x1aa   : > { %v724_v28 = vpop.f32.mrb[6].mxu0  ;;  %v2071_v35 = vmax.f32 %v721_v8, 0.0 }
 0x1ab   : > { %v726_v29 = vpop.f32.mrb[7].mxu0  ;;  %861 = vrot.lane.b32.xlu1 %v2017_v3, %s1724_s29  ;;  %v725_v36 = vadd.f32 %v724_v28, %v626_v34 }
 0x1ac   : > { %759 = vrot.lane.b32.xlu0 %v2029_v5, %s1722_s27  ;;  %v727_v38 = vadd.f32 %v726_v29, %v626_v34 }
 0x1ad   : > { %v2077_v37 = vmax.f32 %v725_v36, 0.0 }
 0x1ae   : > { %v2095_v41 = vmax.f32 %v727_v38, 0.0 }
 0x1af   : > { %913 = vrot.lane.b32.xlu1 %v2017_v3, %s1725_s10 }
 0x1b0   : > { %811 = vrot.lane.b32.xlu0 %v2029_v5, %s1723_s28 }
 0x1b3   : > { %969 = vrot.lane.b32.xlu1 %v2017_v3, %s1726_s11 }
 0x1b4   : > { %863 = vrot.lane.b32.xlu0 %v2029_v5, %s1724_s29 }
 0x1b7   : > { %1021 = vrot.lane.b32.xlu1 %v2017_v3, %s1727_s12 }
 0x1b8   : > { %915 = vrot.lane.b32.xlu0 %v2029_v5, %s1725_s10 }
 0x1bb   : > { %741 = vrot.lane.b32.xlu1 %v2019_v4, %s1722_s27 }
 0x1bc   : > { %743 = vrot.lane.b32.xlu0 %v2047_v31, %s1722_s27 }
 0x1bf   : > { %797 = vrot.lane.b32.xlu1 %v2019_v4, %s1723_s28 }
 0x1c0   : > { %799 = vrot.lane.b32.xlu0 %v2047_v31, %s1723_s28 }
 0x1c3   : > { %849 = vrot.lane.b32.xlu1 %v2019_v4, %s1724_s29 }
 0x1c4   : > { %851 = vrot.lane.b32.xlu0 %v2047_v31, %s1724_s29 }
 0x1c7   : > { %901 = vrot.lane.b32.xlu1 %v2019_v4, %s1725_s10 }
 0x1c8   : > { %903 = vrot.lane.b32.xlu0 %v2047_v31, %s1725_s10 }
 0x1cb   : > { %973 = vrot.lane.b32.xlu1 %v2029_v5, %s1726_s11 }
 0x1cc   : > { %975 = vrot.lane.b32.xlu0 %v2047_v31, %s1726_s11 }
 0x1cf   : > { %761 = vrot.lane.b32.xlu1 %v2069_v7, %s1722_s27 }
 0x1d0   : > { %979 = vrot.lane.b32.xlu0 %v2071_v35, %s1726_s11 }
 0x1d3   : > { %813 = vrot.lane.b32.xlu1 %v2069_v7, %s1723_s28 }
 0x1d4   : > { %763 = vrot.lane.b32.xlu0 %v2077_v37, %s1722_s27 }
 0x1d7   : > { %865 = vrot.lane.b32.xlu1 %v2069_v7, %s1724_s29 }
 0x1d8   : > { %815 = vrot.lane.b32.xlu0 %v2077_v37, %s1723_s28 }
 0x1db   : > { %917 = vrot.lane.b32.xlu1 %v2069_v7, %s1725_s10 }
 0x1dc   : > { %867 = vrot.lane.b32.xlu0 %v2077_v37, %s1724_s29 }
 0x1df   : > { %977 = vrot.lane.b32.xlu1 %v2069_v7, %s1726_s11 }
 0x1e0   : > { %919 = vrot.lane.b32.xlu0 %v2077_v37, %s1725_s10 }
 0x1e3   : > { %745 = vrot.lane.b32.xlu1 %v2071_v35, %s1722_s27 }
 0x1e4   : > { %747 = vrot.lane.b32.xlu0 %v2095_v41, %s1722_s27 }
 0x1e7   : > { %1025 = vrot.lane.b32.xlu1 %v2029_v5, %s1727_s12 }
 0x1e8   : > { %1027 = vrot.lane.b32.xlu0 %v2047_v31, %s1727_s12 }
 0x1eb   : > { %801 = vrot.lane.b32.xlu1 %v2071_v35, %s1723_s28 }
 0x1ec   : > { %803 = vrot.lane.b32.xlu0 %v2095_v41, %s1723_s28 }
 0x1ef   : > { %853 = vrot.lane.b32.xlu1 %v2071_v35, %s1724_s29 }
 0x1f0   : > { %1031 = vrot.lane.b32.xlu0 %v2071_v35, %s1727_s12 }
 0x1f3   : > { %905 = vrot.lane.b32.xlu1 %v2071_v35, %s1725_s10 }
 0x1f4   : > { %855 = vrot.lane.b32.xlu0 %v2095_v41, %s1724_s29 }
 0x1f7   : > { %981 = vrot.lane.b32.xlu1 %v2077_v37, %s1726_s11 }
 0x1f8   : > { %1075 = vrot.lane.b32.xlu0 %v2019_v4, %s1728_s13 }
 0x1fb   : > { %1029 = vrot.lane.b32.xlu1 %v2069_v7, %s1727_s12 }
 0x1fc   : > { %907 = vrot.lane.b32.xlu0 %v2095_v41, %s1725_s10 }
 0x1ff   : > { %1033 = vrot.lane.b32.xlu1 %v2077_v37, %s1727_s12 }
 0x200   : > { %1079 = vrot.lane.b32.xlu0 %v2047_v31, %s1728_s13 }
 0x203   : > { %1073 = vrot.lane.b32.xlu1 %v2017_v3, %s1728_s13 }
 0x204   : > { %1127 = vrot.lane.b32.xlu0 %v2019_v4, %s1729_s16 }
 0x207   : > { %1077 = vrot.lane.b32.xlu1 %v2029_v5, %s1728_s13 }
 0x208   : > { %1131 = vrot.lane.b32.xlu0 %v2047_v31, %s1729_s16 }
 0x20b   : > { %1125 = vrot.lane.b32.xlu1 %v2017_v3, %s1729_s16 }
 0x20c   : > { %983 = vrot.lane.b32.xlu0 %v2095_v41, %s1726_s11 }
 0x20f   : > { %1129 = vrot.lane.b32.xlu1 %v2029_v5, %s1729_s16 }
 0x210   : > { %1083 = vrot.lane.b32.xlu0 %v2071_v35, %s1728_s13 }
 0x213   : > { %1081 = vrot.lane.b32.xlu1 %v2069_v7, %s1728_s13 }
 0x214   : > { %1035 = vrot.lane.b32.xlu0 %v2095_v41, %s1727_s12 }
 0x215   : > { %v758_v42 = vpop.permute.xlu1 %757 }
 0x216   : > { %v972_v47 = vpop.permute.xlu0 %971 }
 0x217   : > { %1085 = vrot.lane.b32.xlu1 %v2077_v37, %s1728_s13 }
 0x218   : > { %1135 = vrot.lane.b32.xlu0 %v2071_v35, %s1729_s16 }
 0x219   : > { %v2156_v49 = vpop.permute.xlu1 %809 }
 0x21a   : > { %v1024_v50 = vpop.permute.xlu0 %1023 }
 0x21b   : > { %1133 = vrot.lane.b32.xlu1 %v2069_v7, %s1729_s16 }
 0x21c   : > { %1087 = vrot.lane.b32.xlu0 %v2095_v41, %s1728_s13 }
 0x21d   : > { %v2163_v52 = vpop.permute.xlu1 %861 }
 0x21e   : > { %v760_v53 = vpop.permute.xlu0 %759 }
 0x21f   : > { %1137 = vrot.lane.b32.xlu1 %v2077_v37, %s1729_s16 }
 0x220   : > { %1139 = vrot.lane.b32.xlu0 %v2095_v41, %s1729_s16 }
 0x221   : > { %v2172_v55 = vpop.permute.xlu1 %913 }
 0x222   : > { %v812_v57 = vpop.permute.xlu0 %811 }
 0x223   : > { %1267 = vperm.xlu1 %1713, %v1261_v54  }
 0x224   : > { %1272 = vperm.xlu0 %1712, %v1262_v56  }
 0x225   : > { %v970_v12 = vpop.permute.xlu1 %969 }
 0x226   : > { %v2184_v58 = vsel %vm428_vm4, %v970_v12, %v972_v47  ;;  %v2187_v63 = vsel %vm428_vm4, %v972_v47, %v970_v12  ;;  %v2189_v0 = vpop.permute.xlu0 %863 }
 0x227   : > { %1277 = vperm.xlu1 %1713, %v1263_v11  }
 0x228   : > { %1282 = vperm.xlu0 %1712, %v1264_v15  }
 0x229   : > { %v1022_v1 = vpop.permute.xlu1 %1021 }
 0x22a   : > { %v2192_v13 = vsel %vm463_vm5, %v1022_v1, %v1024_v50  ;;  %v2195_v14 = vsel %vm463_vm5, %v1024_v50, %v1022_v1  ;;  %v2197_v16 = vpop.permute.xlu0 %915 }
 0x22b   : > { %2515 = vst [vmem:[#allocation9_spill] sm:$0xff] %v2192_v13 }
 0x22d   : > { %v742_v2 = vpop.permute.xlu1 %741 }
 0x22e   : > { %v765_v6 = vsel %vm274_vm1, %v758_v42, %v742_v2  ;;  %v777_v17 = vsel %vm274_vm1, %v742_v2, %v758_v42  ;;  %v744_v18 = vpop.permute.xlu0 %743 }
 0x22f   : > { %v781_v19 = vmul.f32 %v777_v17, %v1869_v27  ;;  %v766_v20 = vsel %vm274_vm1, %v760_v53, %v744_v18  ;;  %v778_v21 = vsel %vm274_vm1, %v744_v18, %v760_v53  ;;  %v782_v28 = vmul.f32 %v765_v6, %v1866_v26 }
 0x230   : > { %v783_v29 = vmul.f32 %v778_v21, %v1869_v27  ;;  %v784_v30 = vmul.f32 %v766_v20, %v1866_v26 }
 0x231   : > { %v798_v32 = vpop.permute.xlu1 %797 }
 0x232   : > { %v800_v33 = vpop.permute.xlu0 %799  ;;  %v1606_v8 = vpack.c.bf16 %v784_v30, %v782_v28  ;;  %v1608_v34 = vpack.c.bf16 %v783_v29, %v781_v19  ;;  %v817_v29 = vsel %vm309_vm0, %v2156_v49, %v798_v32 }
 0x233   : > { %v818_v30 = vsel %vm309_vm0, %v812_v57, %v800_v33  ;;  %v834_v39 = vmul.f32 %v817_v29, %v1884_v44 }
 0x234   : > { %1607 = vmatprep.subr.bf16.mxu1 %v1606_v8  ;;  %v836_v59 = vmul.f32 %v818_v30, %v1884_v44 }
 0x235   : > { %1609 = vmatpush1.bf16.msra.mxu1 %v1608_v34  ;;  %v850_v36 = vpop.permute.xlu1 %849  ;;  %v829_v34 = vsel %vm309_vm0, %v798_v32, %v2156_v49 }
 0x236   : > { %v852_v38 = vpop.permute.xlu0 %851 }
 0x239   : > { %v2207_v42 = vpop.permute.xlu1 %901 }
 0x23a   : > { %v933_v47 = vsel %vm379_vm3, %v2207_v42, %v2172_v55  ;;  %v2212_v48 = vpop.permute.xlu0 %903 }
 0x23b   : > { %v2215_v50 = vmul.f32 %v933_v47, %v1911_v24  ;;  %v934_v53 = vsel %vm379_vm3, %v2212_v48, %v2197_v16  ;;  %v830_v47 = vsel %vm309_vm0, %v800_v33, %v812_v57  ;;  %v833_v33 = vmul.f32 %v829_v34, %v1881_v43 }
 0x23c   : > { %v2221_v54 = vmul.f32 %v934_v53, %v1911_v24 }
 0x23d   : > { %v2223_v56 = vpop.permute.xlu1 %973 }
 0x23e   : > { %v2225_v11 = vpop.permute.xlu0 %975 }
 0x241   : > { %v762_v15 = vpop.permute.xlu1 %761 }
 0x242   : > { %v2229_v1 = vpop.permute.xlu0 %979 }
 0x245   : > { %v814_v2 = vpop.permute.xlu1 %813 }
 0x246   : > { %v764_v6 = vpop.permute.xlu0 %763 }
 0x249   : > { %v866_v17 = vpop.permute.xlu1 %865 }
 0x24a   : > { %v816_v18 = vpop.permute.xlu0 %815 }
 0x24d   : > { %v2231_v19 = vpop.permute.xlu1 %917 }
 0x24e   : > { %v2233_v20 = vpop.permute.xlu0 %867 }
 0x251   : > { %v2235_v21 = vpop.permute.xlu1 %977 }
 0x252   : > { %v2237_v28 = vpop.permute.xlu0 %919 }
 0x255   : > { %v746_v8 = vpop.permute.xlu1 %745 }
 0x256   : > { %v767_v53 = vsel %vm274_vm1, %v762_v15, %v746_v8  ;;  %v779_v51 = vsel %vm274_vm1, %v746_v8, %v762_v15  ;;  %v748_v12 = vpop.permute.xlu0 %747 }
 0x257   : > { %v785_v22 = vmul.f32 %v779_v51, %v1869_v27  ;;  %v786_v23 = vmul.f32 %v767_v53, %v1866_v26  ;;  %v768_v13 = vsel %vm274_vm1, %v764_v6, %v748_v12  ;;  %v780_v40 = vsel %vm274_vm1, %v748_v12, %v764_v6 }
 0x258   : > { %v787_v49 = vmul.f32 %v780_v40, %v1869_v27  ;;  %v788_v57 = vmul.f32 %v768_v13, %v1866_v26  ;;  %v835_v51 = vmul.f32 %v830_v47, %v1881_v43  ;;  %v1614_v12 = vpack.c.bf16 %v836_v59, %v834_v39 }
 0x259   : > { %v2255_v32 = vpop.permute.xlu1 %1025  ;;  %v869_v6 = vsel %vm344_vm2, %v2163_v52, %v850_v36  ;;  %v881_v27 = vsel %vm344_vm2, %v850_v36, %v2163_v52  ;;  %v870_v26 = vsel %vm344_vm2, %v2189_v0, %v852_v38  ;;  %v882_v13 = vsel %vm344_vm2, %v852_v38, %v2189_v0 }
 0x25a   : > { %v2259_v15 = vpop.permute.xlu0 %1027  ;;  %v1610_v8 = vpack.c.bf16 %v788_v57, %v786_v23  ;;  %v1612_v53 = vpack.c.bf16 %v787_v49, %v785_v22  ;;  %v1616_v59 = vpack.c.bf16 %v835_v51, %v833_v33  ;;  %v886_v34 = vmul.f32 %v869_v6, %v1899_v61 }
 0x25b   : > { %v888_v47 = vmul.f32 %v870_v26, %v1899_v61  ;;  %v885_v49 = vmul.f32 %v881_v27, %v1896_v60  ;;  %v887_v57 = vmul.f32 %v882_v13, %v1896_v60 }
 0x25c   : > { %1611 = vmatprep.subr.bf16.mxu1 %v1610_v8 }
 0x25d   : > { %1613 = vmatpush1.bf16.msra.mxu1 %v1612_v53  ;;  %v802_v40 = vpop.permute.xlu1 %801  ;;  %v1624_v26 = vpack.c.bf16 %v887_v57, %v885_v49  ;;  %v2516_v49 = vpack.c.bf16 %v2221_v54, %v2215_v50  ;;  %v1002_v50 = vsel %vm428_vm4, %v2225_v11, %v2223_v56 }
 0x25e   : > { %v819_v29 = vsel %vm309_vm0, %v814_v2, %v802_v40  ;;  %v831_v22 = vsel %vm309_vm0, %v802_v40, %v814_v2  ;;  %v804_v23 = vpop.permute.xlu0 %803  ;;  %1615 = vmatprep.subr.bf16.mxu1 %v1614_v12 }
 0x25f   : > { %v837_v39 = vmul.f32 %v831_v22, %v1881_v43  ;;  %v838_v30 = vmul.f32 %v819_v29, %v1884_v44  ;;  %v820_v52 = vsel %vm309_vm0, %v816_v18, %v804_v23  ;;  %v832_v36 = vsel %vm309_vm0, %v804_v23, %v816_v18 }
 0x260   : > { %v839_v0 = vmul.f32 %v832_v36, %v1881_v43  ;;  %v840_v38 = vmul.f32 %v820_v52, %v1884_v44  ;;  %v921_v18 = vsel %vm379_vm3, %v2172_v55, %v2207_v42  ;;  %v922_v43 = vsel %vm379_vm3, %v2197_v16, %v2212_v48 }
 0x261   : > { %1617 = vmatpush1.bf16.msra.mxu1 %v1616_v59  ;;  %v854_v2 = vpop.permute.xlu1 %853  ;;  %v1622_v44 = vpack.c.bf16 %v888_v47, %v886_v34  ;;  %v938_v40 = vmul.f32 %v921_v18, %v1914_v25  ;;  %v940_v13 = vmul.f32 %v922_v43, %v1914_v25  ;;  %v956_v47 = vmul.f32 %v2047_v31, %v1805_v9 }
 0x262   : > { %v2281_v33 = vpop.permute.xlu0 %1031  ;;  %v1618_v51 = vpack.c.bf16 %v840_v38, %v838_v30  ;;  %v1620_v8 = vpack.c.bf16 %v839_v0, %v837_v39  ;;  %v871_v53 = vsel %vm344_vm2, %v866_v17, %v854_v2  ;;  %v883_v12 = vsel %vm344_vm2, %v854_v2, %v866_v17 }
 0x263   : > { %v889_v42 = vmul.f32 %v883_v12, %v1896_v60  ;;  %v890_v48 = vmul.f32 %v871_v53, %v1899_v61  ;;  %v1630_v30 = vpack.c.bf16 %v940_v13, %v938_v40  ;;  %v954_v31 = vmul.f32 %v2019_v4, %v1805_v9 }
 0x264   : > { %1619 = vmatprep.subr.bf16.mxu1 %v1618_v51  ;;  %v955_v18 = vmul.f32 %v2029_v5, %v1808_v10  ;;  %v953_v43 = vmul.f32 %v2017_v3, %v1808_v10  ;;  %v958_v4 = vmul.f32 %v2071_v35, %v1805_v9  ;;  %v986_v5 = vsel %vm428_vm4, %v2223_v56, %v2225_v11 }
 0x265   : > { %1621 = vmatpush1.bf16.msra.mxu1 %v1620_v8  ;;  %v906_v6 = vpop.permute.xlu1 %905  ;;  %v959_v53 = vmul.f32 %v2077_v37, %v1808_v10  ;;  %v1008_v12 = vmul.f32 %v1002_v50, %v1929_v46  ;;  %v957_v3 = vmul.f32 %v2069_v7, %v1808_v10  ;;  %v987_v56 = vsel %vm428_vm4, %v2235_v21, %v2229_v1 }
 0x266   : > { %v856_v27 = vpop.permute.xlu0 %855  ;;  %1623 = vmatprep.subr.bf16.mxu1 %v1622_v44  ;;  %v935_v52 = vsel %vm379_vm3, %v906_v6, %v2231_v19  ;;  %v1005_v11 = vmul.f32 %v2184_v58, %v1926_v45  ;;  %v1003_v40 = vsel %vm428_vm4, %v2229_v1, %v2235_v21  ;;  %v1054_v10 = vsel %vm463_vm5, %v2259_v15, %v2255_v32 }
 0x267   : > { %v872_v55 = vsel %vm344_vm2, %v2233_v20, %v856_v27  ;;  %v884_v16 = vsel %vm344_vm2, %v856_v27, %v2233_v20  ;;  %v923_v20 = vsel %vm379_vm3, %v2231_v19, %v906_v6  ;;  %v941_v0 = vmul.f32 %v935_v52, %v1911_v24 }
 0x268   : > { %v891_v17 = vmul.f32 %v884_v16, %v1896_v60  ;;  %v892_v29 = vmul.f32 %v872_v55, %v1899_v61  ;;  %v942_v38 = vmul.f32 %v923_v20, %v1914_v25  ;;  %v1644_v37 = vpack.c.bf16 %v959_v53, %v957_v3  ;;  %v2521_v53 = vld [vmem:[#allocation6_spill] sm:$0xff] }
 0x269   : > { %1625 = vmatpush1.bf16.msra.mxu1 %v1624_v26  ;;  %v2301_v22 = vpop.permute.xlu1 %981  ;;  %v1006_v26 = vmul.f32 %v2187_v63, %v1929_v46  ;;  %v1009_v13 = vmul.f32 %v987_v56, %v1926_v45  ;;  %v1038_v55 = vsel %vm463_vm5, %v2255_v32, %v2259_v15  ;;  %v1060_v1 = vmul.f32 %v1054_v10, %v1950_v62 }
 0x26a   : > { %v2303_v23 = vpop.permute.xlu0 %1075  ;;  %v1626_v59 = vpack.c.bf16 %v892_v29, %v890_v48  ;;  %v1628_v39 = vpack.c.bf16 %v891_v17, %v889_v42  ;;  %v1010_v42 = vmul.f32 %v1003_v40, %v1929_v46  ;;  %v1058_v15 = vmul.f32 %v2195_v14, %v1950_v62 }
 0x26b   : > { %v1646_v7 = vpack.c.bf16 %v1008_v12, %v1006_v26 }
 0x26c   : > { %1627 = vmatprep.subr.bf16.mxu1 %v1626_v59 }
 0x26d   : > { %1629 = vmatpush1.bf16.msra.mxu1 %v1628_v39  ;;  %v2309_v36 = vpop.permute.xlu1 %1029  ;;  %v2517_v39 = vld [vmem:[#allocation4_spill] sm:$0xff] }
 0x26e   : > { %v908_v60 = vpop.permute.xlu0 %907  ;;  %1631 = vmatprep.subr.bf16.mxu1 %v1630_v30  ;;  %v1059_v30 = vmul.f32 %v1038_v55, %v2517_v39  ;;  %v1039_v20 = vsel %vm463_vm5, %v2309_v36, %v2281_v33 }
 0x26f   : > { %v924_v61 = vsel %vm379_vm3, %v2237_v28, %v908_v60  ;;  %v936_v34 = vsel %vm379_vm3, %v908_v60, %v2237_v28  ;;  %v1061_v50 = vmul.f32 %v1039_v20, %v2517_v39 }
 0x270   : > { %v943_v19 = vmul.f32 %v936_v34, %v1911_v24  ;;  %v944_v2 = vmul.f32 %v924_v61, %v1914_v25  ;;  %v1638_v24 = vpack.c.bf16 %v956_v47, %v954_v31  ;;  %v960_v25 = vmul.f32 %v2095_v41, %v1805_v9  ;;  %v2518_v47 = vld [vmem:[#allocation7_spill] sm:$0xff] }
 0x271   : > { %1633 = vmatpush1.bf16.msra.mxu1 %v2516_v49  ;;  %v2324_v57 = vpop.permute.xlu1 %1033  ;;  %v1640_v41 = vpack.c.bf16 %v955_v18, %v953_v43  ;;  %v1007_v9 = vmul.f32 %v986_v5, %v1926_v45 }
 0x272   : > { %v2326_v51 = vpop.permute.xlu0 %1079  ;;  %v1634_v28 = vpack.c.bf16 %v944_v2, %v942_v38  ;;  %v1636_v8 = vpack.c.bf16 %v943_v19, %v941_v0  ;;  %v1642_v6 = vpack.c.bf16 %v960_v25, %v958_v4  ;;  %v2519_v0 = vld [vmem:[#allocation8_spill] sm:$0xff]  ;;  %v2520_v2 = vld [vmem:[#allocation9_spill] sm:$0xff] }
 0x273   : > { %v1648_v58 = vpack.c.bf16 %v1007_v9, %v1005_v11  ;;  %v1057_v49 = vmul.f32 %v2520_v2, %v2517_v39  ;;  %v2522_v11 = vld [vmem:[#allocation5_spill] sm:$0xff] }
 0x274   : > { %1635 = vmatprep.subr.bf16.mxu1 %v1634_v28  ;;  %v1055_v28 = vsel %vm463_vm5, %v2281_v33, %v2309_v36  ;;  %v1186_v2 = vld [vmem:[%s2495_s4 + $0x48] sm:$0xff] }
 0x275   : > { %1637 = vmatpush1.bf16.msra.mxu1 %v1636_v8  ;;  %v2337_v54 = vpop.permute.xlu1 %1073  ;;  %v1654_v8 = vpack.c.bf16 %v1060_v1, %v1058_v15  ;;  %v1062_v4 = vmul.f32 %v1055_v28, %v1950_v62  ;;  %v1188_v28 = vld [vmem:[%s2495_s4 + $0x58] sm:$0xff] }
 0x276   : > { %v1128_v44 = vpop.permute.xlu0 %1127  ;;  %1639 = vmatprep.subr.bf16.mxu1 %v1638_v24  ;;  %v1105_v33 = vsel %vm498_vm6, %v2303_v23, %v2337_v54  ;;  %v1089_v9 = vsel %vm498_vm6, %v2337_v54, %v2303_v23 }
 0x277   : > { %v1109_v40 = vmul.f32 %v1089_v9, %v2522_v11 }
 0x279   : > { %v1078_v27 = vpop.permute.xlu1 %1077  ;;  %1641 = vmatpush1.bf16.msra.mxu1 %v1640_v41 }
 0x27a   : > { %v1132_v35 = vpop.permute.xlu0 %1131  ;;  %1643 = vmatprep.subr.bf16.mxu1 %v1642_v6  ;;  %v1106_v31 = vsel %vm498_vm6, %v2326_v51, %v1078_v27  ;;  %v1090_v41 = vsel %vm498_vm6, %v1078_v27, %v2326_v51 }
 0x27b   : > { %v1112_v12 = vmul.f32 %v1106_v31, %v2521_v53  ;;  %v1111_v51 = vmul.f32 %v1090_v41, %v2522_v11 }
 0x27d   : > { %v1126_v63 = vpop.permute.xlu1 %1125  ;;  %1645 = vmatpush1.bf16.msra.mxu1 %v1644_v37 }
 0x27e   : > { %v984_v16 = vpop.permute.xlu0 %983  ;;  %1647 = vmatprep.subr.bf16.mxu1 %v1646_v7  ;;  %v1141_v17 = vsel %vm533_vm7, %v1126_v63, %v1128_v44  ;;  %v1157_v29 = vsel %vm533_vm7, %v1128_v44, %v1126_v63  ;;  %v1656_v44 = vpack.c.bf16 %v1059_v30, %v1057_v49  ;;  %v1185_v49 = vld [vmem:[%s2495_s4 + $0x40] sm:$0xff] }
 0x27f   : > { %v988_v21 = vsel %vm428_vm4, %v2301_v22, %v984_v16  ;;  %v1004_v48 = vsel %vm428_vm4, %v984_v16, %v2301_v22  ;;  %v1162_v38 = vmul.f32 %v2519_v0, %v1157_v29 }
 0x280   : > { %v1011_v59 = vmul.f32 %v988_v21, %v1926_v45  ;;  %v1012_v32 = vmul.f32 %v1004_v48, %v1929_v46  ;;  %v1161_v46 = vmul.f32 %v2518_v47, %v1141_v17 }
 0x281   : > { %v1130_v52 = vpop.permute.xlu1 %1129  ;;  %1649 = vmatpush1.bf16.msra.mxu1 %v1648_v58 }
 0x282   : > { %v1142_v22 = vsel %vm533_vm7, %v1130_v52, %v1132_v35  ;;  %v1158_v60 = vsel %vm533_vm7, %v1132_v35, %v1130_v52  ;;  %v1084_v61 = vpop.permute.xlu0 %1083  ;;  %v1650_v34 = vpack.c.bf16 %v1012_v32, %v1010_v42  ;;  %v1652_v45 = vpack.c.bf16 %v1011_v59, %v1009_v13 }
 0x283   : > { %v1163_v14 = vmul.f32 %v2518_v47, %v1142_v22  ;;  %v1164_v19 = vmul.f32 %v2519_v0, %v1158_v60  ;;  %v1110_v35 = vmul.f32 %v1105_v33, %v2521_v53  ;;  %v1664_v13 = vpack.c.bf16 %v1111_v51, %v1109_v40  ;;  %v1177_v22 = vld [vmem:[%s2495_s4] sm:$0xff] }
 0x284   : > { %1651 = vmatprep.subr.bf16.mxu1 %v1650_v34  ;;  %v1181_v34 = vld [vmem:[%s2495_s4 + $0x20] sm:$0xff] }
 0x285   : > { %v1672_v18 = vpack.c.bf16 %v1163_v14, %v1161_v46  ;;  %v1082_v24 = vpop.permute.xlu1 %1081  ;;  %1653 = vmatpush1.bf16.msra.mxu1 %v1652_v45  ;;  %v1670_v25 = vpack.c.bf16 %v1164_v19, %v1162_v38  ;;  %v1662_v27 = vpack.c.bf16 %v1112_v12, %v1110_v35  ;;  %v1180_v45 = vld [vmem:[%s2495_s4 + $0x18] sm:$0xff]  ;;  %v1183_v38 = vld [vmem:[%s2495_s4 + $0x30] sm:$0xff]  ;;  %v1182_v14 = vld [vmem:[%s2495_s4 + $0x28] sm:$0xff] }
 0x286   : > { %v1036_v43 = vpop.permute.xlu0 %1035  ;;  %1655 = vmatprep.subr.bf16.mxu1 %v1654_v8  ;;  %v1107_v10 = vsel %vm498_vm6, %v1084_v61, %v1082_v24  ;;  %v1184_v46 = vld [vmem:[%s2495_s4 + $0x38] sm:$0xff]  ;;  %v1187_v19 = vld [vmem:[%s2495_s4 + $0x50] sm:$0xff] }
 0x287   : > { %v1040_v36 = vsel %vm463_vm5, %v2324_v57, %v1036_v43  ;;  %v1056_v5 = vsel %vm463_vm5, %v1036_v43, %v2324_v57  ;;  %1671 = vmatprep.subr.bf16.mxu0 %v1670_v25  ;;  %v1114_v16 = vmul.f32 %v1107_v10, %v2521_v53 }
 0x288   : > { %v1063_v6 = vmul.f32 %v1040_v36, %v2517_v39  ;;  %v1064_v3 = vmul.f32 %v1056_v5, %v1950_v62  ;;  %1673 = vmatpush1.bf16.msra.mxu0 %v1672_v18  ;;  %v1091_v62 = vsel %vm498_vm6, %v1082_v24, %v1084_v61 }
 0x289   : > { %v1086_v26 = vpop.permute.xlu1 %1085  ;;  %1657 = vmatpush1.bf16.msra.mxu1 %v1656_v44  ;;  %v1113_v55 = vmul.f32 %v1091_v62, %v2522_v11 }
 0x28a   : > { %v1136_v57 = vpop.permute.xlu0 %1135  ;;  %v1658_v56 = vpack.c.bf16 %v1064_v3, %v1062_v4  ;;  %v1660_v37 = vpack.c.bf16 %v1063_v6, %v1061_v50 }
 0x28c   : > { %1659 = vmatprep.subr.bf16.mxu1 %v1658_v56 }
 0x28d   : > { %v1134_v7 = vpop.permute.xlu1 %1133  ;;  %1661 = vmatpush1.bf16.msra.mxu1 %v1660_v37 }
 0x28e   : > { %v1088_v63 = vpop.permute.xlu0 %1087  ;;  %1663 = vmatprep.subr.bf16.mxu1 %v1662_v27  ;;  %v1143_v1 = vsel %vm533_vm7, %v1134_v7, %v1136_v57  ;;  %v1159_v21 = vsel %vm533_vm7, %v1136_v57, %v1134_v7 }
 0x28f   : > { %v1092_v23 = vsel %vm498_vm6, %v1086_v26, %v1088_v63  ;;  %v1108_v54 = vsel %vm498_vm6, %v1088_v63, %v1086_v26  ;;  %v1165_v39 = vmul.f32 %v2518_v47, %v1143_v1  ;;  %v1166_v30 = vmul.f32 %v2519_v0, %v1159_v21 }
 0x290   : > { %v1115_v58 = vmul.f32 %v1092_v23, %v2522_v11  ;;  %v1116_v42 = vmul.f32 %v1108_v54, %v2521_v53 }
 0x291   : > { %v1138_v48 = vpop.permute.xlu1 %1137  ;;  %1665 = vmatpush1.bf16.msra.mxu1 %v1664_v13 }
 0x292   : > { %v1140_v17 = vpop.permute.xlu0 %1139  ;;  %v1666_v29 = vpack.c.bf16 %v1116_v42, %v1114_v16  ;;  %v1668_v59 = vpack.c.bf16 %v1115_v58, %v1113_v55 }
 0x293   : > { %v1144_v32 = vsel %vm533_vm7, %v1138_v48, %v1140_v17  ;;  %v1160_v15 = vsel %vm533_vm7, %v1140_v17, %v1138_v48 }
 0x294   : > { %v1167_v20 = vmul.f32 %v2518_v47, %v1144_v32  ;;  %v1168_v52 = vmul.f32 %v2519_v0, %v1160_v15  ;;  %1667 = vmatprep.subr.bf16.mxu1 %v1666_v29  ;;  %v1179_v47 = vld [vmem:[%s2495_s4 + $0x10] sm:$0xff]  ;;  %v2523_v0 = vmov 0.0  }
 0x295   : > { %1669 = vmatpush1.bf16.msra.mxu1 %v1668_v59 }
 0x296   : > { %v1676_v60 = vpack.c.bf16 %v1167_v20, %v1165_v39  ;;  %v1674_v61 = vpack.c.bf16 %v1168_v52, %v1166_v30 }
 0x298   : > { %1363 = vmatmul.mubr.f32.vlgmr.msra.gmra.mrb[0].mxu1 %v1177_v22  ;;  %1675 = vmatprep.subr.bf16.mxu0 %v1674_v61 }
 0x299   : > { %1677 = vmatpush1.bf16.msra.mxu0 %v1676_v60  ;;  %1368 = vmatprep.mubr.f32.mxu1 %v1181_v34 }
 0x29c   : > { %1369 = vmatmul.mubr.f32.gmra.mrb[2].mxu1 %v1180_v45  ;;  %1562 = vmatmul.mubr.msk.f32.vlgmr.msra.gmra.mrb[8].mxu0 %vm1285_vm8, %v1179_v47 }
 0x29d   : > { %1374 = vmatprep.mubr.f32.mxu1 %v1184_v46  ;;  %1457 = vmatprep.mubr.f32.mxu0 %v2523_v0 }
 0x2a0   : > { %1375 = vmatmul.mubr.f32.gmra.mrb[4].mxu1 %v1183_v38  ;;  %1563 = vmatmul.mubr.msk.f32.gmra.mrb[10].mxu0 %vm1285_vm8, %v1182_v14 }
 0x2a1   : > { %1380 = vmatprep.mubr.f32.mxu1 %v1187_v19  ;;  %1463 = vmatprep.mubr.f32.mxu0 %v2523_v0 }
 0x2a2   : > { %v1268_v18 = vpop.permute.xlu1 %1267 }
 0x2a3   : > { %v1273_v36 = vpop.permute.xlu0 %1272 }
 0x2a4   : > { %1381 = vmatmul.mubr.f32.gmra.mrb[6].mxu1 %v1186_v2  ;;  %1564 = vmatmul.mubr.msk.f32.gmra.mrb[12].mxu0 %vm1285_vm8, %v1185_v49 }
 0x2a5   : > { %1469 = vmatprep.mubr.f32.mxu0 %v2523_v0 }
 0x2a6   : > { %v1278_v56 = vpop.permute.xlu1 %1277 }
 0x2a7   : > { %v1283_v54 = vpop.permute.xlu0 %1282 }
 0x2a8   : > { %1565 = vmatmul.mubr.msk.f32.gmra.mrb[14].mxu0 %vm1285_vm8, %v1188_v28 }
 0x36b   : > { %v1364_v8 = vpop.f32.mrb[0].mxu1 }
 0x36c   : > { %v1366_v31 = vpop.f32.mrb[1].mxu1  ;;  %v1365_v24 = vadd.f32 %v1364_v8, %v1268_v18 }
 0x36d   : > { %v1367_v25 = vadd.f32 %v1366_v31, %v1268_v18 }
 0x36f   : > { %v1370_v50 = vpop.f32.mrb[2].mxu1  ;;  %v1453_v43 = vpop.f32.mrb[8].mxu0 }
 0x370   : > { %v1454_v44 = vadd.f32 %v1453_v43, %v1365_v24  ;;  %v1372_v4 = vpop.f32.mrb[3].mxu1  ;;  %v1455_v33 = vpop.f32.mrb[9].mxu0  ;;  %v1371_v41 = vadd.f32 %v1370_v50, %v1273_v36 }
 0x371   : > { %v1456_v5 = vadd.f32 %v1455_v33, %v1367_v25  ;;  %v1373_v12 = vadd.f32 %v1372_v4, %v1273_v36 }
 0x372   : > { %v1476_v53 = vmax.f32 %v1454_v44, 0.0 }
 0x373   : > { %v1477_v6 = vmax.f32 %v1456_v5, 0.0  ;;  %v1376_v3 = vpop.f32.mrb[4].mxu1  ;;  %v1459_v26 = vpop.f32.mrb[10].mxu0 }
 0x374   : > { %1484 = vst [vmem:[%s2478_s20] sm:$0xff] %v1476_v53  ;;  %v1460_v9 = vadd.f32 %v1459_v26, %v1371_v41  ;;  %v1378_v35 = vpop.f32.mrb[5].mxu1  ;;  %v1461_v57 = vpop.f32.mrb[11].mxu0  ;;  %v1377_v11 = vadd.f32 %v1376_v3, %v1278_v56 }
 0x375   : > { %1485 = vst [vmem:[%s2478_s20 + $0x8] sm:$0xff] %v1477_v6  ;;  %v1462_v37 = vadd.f32 %v1461_v57, %v1373_v12  ;;  %v1379_v27 = vadd.f32 %v1378_v35, %v1278_v56 }
 0x376   : > { %v1478_v51 = vmax.f32 %v1460_v9, 0.0 }
 0x377   : > { %v1479_v40 = vmax.f32 %v1462_v37, 0.0  ;;  %v1382_v62 = vpop.f32.mrb[6].mxu1  ;;  %v1465_v10 = vpop.f32.mrb[12].mxu0 }
 0x378   : > { %1486 = vst [vmem:[%s2478_s20 + $0x10] sm:$0xff] %v1478_v51  ;;  %v1466_v7 = vadd.f32 %v1465_v10, %v1377_v11  ;;  %v1384_v63 = vpop.f32.mrb[7].mxu1  ;;  %v1467_v23 = vpop.f32.mrb[13].mxu0  ;;  %v1383_v55 = vadd.f32 %v1382_v62, %v1283_v54 }
 0x379   : > { %1487 = vst [vmem:[%s2478_s20 + $0x18] sm:$0xff] %v1479_v40  ;;  %v1468_v13 = vadd.f32 %v1467_v23, %v1379_v27  ;;  %v1385_v58 = vadd.f32 %v1384_v63, %v1283_v54 }
 0x37a   : > { %v1480_v16 = vmax.f32 %v1466_v7, 0.0 }
 0x37b   : > { %v1481_v42 = vmax.f32 %v1468_v13, 0.0  ;;  %v1471_v1 = vpop.f32.mrb[14].mxu0 }
 0x37c   : > { %1488 = vst [vmem:[%s2478_s20 + $0x20] sm:$0xff] %v1480_v16  ;;  %v1472_v21 = vadd.f32 %v1471_v1, %v1383_v55  ;;  %v1473_v48 = vpop.f32.mrb[15].mxu0 }
 0x37d   : > { %1489 = vst [vmem:[%s2478_s20 + $0x28] sm:$0xff] %v1481_v42  ;;  %v1474_v17 = vadd.f32 %v1473_v48, %v1385_v58 }
 0x37e   : > { %v1482_v29 = vmax.f32 %v1472_v21, 0.0 }
 0x37f   : > { %v1483_v59 = vmax.f32 %v1474_v17, 0.0 }
 0x380   : > { %1490 = vst [vmem:[%s2478_s20 + $0x30] sm:$0xff] %v1482_v29 }
 0x381   : > { %1491 = vst [vmem:[%s2478_s20 + $0x38] sm:$0xff] %v1483_v59 }
 0x382 PF: > { %s16_s21 = sadd.s32 1, %s1720_s21  }
 0x383   : > { %p13_p4 = scmp.ge.s32.totalorder %s16_s21, 4  }
 0x385   :  { %15 = sbr.rel (!%p13_p4) target bundleno = 1 (0x1), region = 74 }

</bundles_post_ra>
